<compile_context>
chip_gen: v6e
topology: v6e:2x2x1
jax: 0.10.0
libtpu: 0.0.40
codegen_flags: <defaults>
</compile_context>

<pallas_src>
import functools

import jax
import jax.numpy as jnp
from jax.experimental import pallas as pl
from jax.experimental.pallas import tpu as pltpu


# ---------------------------------------------------------------------------
# Fused Spikf_Block kernel: one grid step = one (batch element, time step).
# ---------------------------------------------------------------------------
def _spikf_block_kernel(x_ref,
                        wq_ref, bq_ref, wk_ref, bk_ref, wv_ref, bv_ref,
                        wp_ref, bp_ref, w1_ref, b1_ref, w2_ref, b2_ref,
                        o_ref,
                        vq_ref, vk_ref, vv_ref, va_ref, vp_ref, v1_ref, v2_ref,
                        *, num_heads, scale, tau, threshold):
    t = pl.program_id(1)

    # Reset all LIF membrane potentials at the start of each batch element's sequence.
    @pl.when(t == 0)
    def _init():
        for ref in (vq_ref, vk_ref, vv_ref, va_ref, vp_ref, v1_ref, v2_ref):
            ref[...] = jnp.zeros_like(ref)

    inv_tau = 1.0 / tau

    def lif(inp, v_ref):
        # TODO(synk): st_LIFNode internals are not public; standard LIF used
        # (v += (x - v)/tau, heaviside spike at threshold, hard reset).
        v = v_ref[...]
        v = v + (inp - v) * inv_tau
        spike = jnp.where(v >= threshold, 1.0, 0.0)
        v_ref[...] = v * (1.0 - spike)
        return spike

    def proj(inp, w_ref, b_ref):
        # 1x1 Conv1d + folded BatchNorm == lane-dense matmul + bias.
        return jnp.dot(inp, w_ref[...], preferred_element_type=jnp.float32) + b_ref[...]

    x = x_ref[0, 0].astype(jnp.float32)          # (N_tokens, C), channels on lanes
    emb = x.shape[1]
    d = emb // num_heads

    # --- SSA: q / k / v paths (conv + folded BN + LIF) ---
    q_s = lif(proj(x, wq_ref, bq_ref), vq_ref)
    k_s = lif(proj(x, wk_ref, bk_ref), vk_ref)
    v_s = lif(proj(x, wv_ref, bv_ref), vv_ref)

    # --- multi-head spiking attention: r = (q k^T * scale) v * scale ---
    r_heads = []
    for h in range(num_heads):                   # static unroll over heads
        lo, hi = h * d, (h + 1) * d
        qh = q_s[:, lo:hi]
        kh = k_s[:, lo:hi]
        vh = v_s[:, lo:hi]
        attn_h = jnp.einsum("nd,md->nm", qh, kh,
                            preferred_element_type=jnp.float32) * scale
        r_heads.append(jnp.dot(attn_h, vh,
                               preferred_element_type=jnp.float32) * scale)
    r = jnp.concatenate(r_heads, axis=-1)        # (N_tokens, C)

    r_s = lif(r, va_ref)                                  # attn_lif
    attn_out = lif(proj(r_s, wp_ref, bp_ref), vp_ref)     # proj conv + BN + proj_lif

    x1 = x + attn_out                                     # residual 1

    # --- spiking MLP ---
    h_s = lif(proj(x1, w1_ref, b1_ref), v1_ref)           # fc1 conv + BN + LIF
    m_s = lif(proj(h_s, w2_ref, b2_ref), v2_ref)          # fc2 conv + BN + LIF
    # TODO(synk): Dropout between fc1 and fc2 skipped (mlp_drop defaults to 0).

    o_ref[0, 0] = (x1 + m_s).astype(o_ref.dtype)          # residual 2


def spikf_block_forward(x_tbcn, params, *, num_heads, scale, tau, threshold):
    """Run the fused Spikf_Block forward.  x_tbcn: (T, B, C, N)."""
    T, B, C, N = x_tbcn.shape
    Ch = params["w1"].shape[1]
    x = jnp.transpose(x_tbcn, (0, 1, 3, 2))      # (T, B, N, C): channels on the lane axis

    kernel = functools.partial(
        _spikf_block_kernel, num_heads=num_heads, scale=scale,
        tau=tau, threshold=threshold)

    def rep(shape):                               # grid-invariant (weight) BlockSpec
        return pl.BlockSpec(shape, lambda b, t: (0,) * len(shape))

    out = pl.pallas_call(
        kernel,
        out_shape=jax.ShapeDtypeStruct((T, B, N, C), jnp.float32),
        grid=(B, T),
        in_specs=[
            pl.BlockSpec((1, 1, N, C), lambda b, t: (t, b, 0, 0)),   # x[t, b]
            rep((C, C)), rep((1, C)),      # q  (BN folded into weight / bias)
            rep((C, C)), rep((1, C)),      # k
            rep((C, C)), rep((1, C)),      # v
            rep((C, C)), rep((1, C)),      # proj
            rep((C, Ch)), rep((1, Ch)),    # fc1
            rep((Ch, C)), rep((1, C)),     # fc2
        ],
        out_specs=pl.BlockSpec((1, 1, N, C), lambda b, t: (t, b, 0, 0)),
        scratch_shapes=[                          # LIF membrane potentials (persist over T)
            pltpu.VMEM((N, C), jnp.float32),      # q_lif
            pltpu.VMEM((N, C), jnp.float32),      # k_lif
            pltpu.VMEM((N, C), jnp.float32),      # v_lif
            pltpu.VMEM((N, C), jnp.float32),      # attn_lif
            pltpu.VMEM((N, C), jnp.float32),      # proj_lif
            pltpu.VMEM((N, Ch), jnp.float32),     # fc1_lif
            pltpu.VMEM((N, C), jnp.float32),      # fc2_lif
        ],
        compiler_params=pltpu.CompilerParams(
            dimension_semantics=("parallel", "arbitrary")),
    )(x, params["wq"], params["bq"], params["wk"], params["bk"],
      params["wv"], params["bv"], params["wp"], params["bp"],
      params["w1"], params["b1"], params["w2"], params["b2"])

    return jnp.transpose(out, (0, 1, 3, 2))       # back to (T, B, C, N)


# ---------------------------------------------------------------------------
# Module wrapper (synthetic deterministic parameters, eval-mode BN folded).
# ---------------------------------------------------------------------------
def _q64(a):
    # Quantize synthetic params/inputs to a 1/64 grid so the spike thresholds in the
    # self-test are insensitive to matmul rounding-order differences (test robustness only).
    return jnp.round(a * 64.0) / 64.0


class SpikfBlockPallas:
    """JAX/Pallas equivalent of Spikf_Block(embed_dim, num_heads, ...) in eval mode."""

    def __init__(self, embed_dim=32, num_heads=4, mlp_ratio=4.0, scale=0.25,
                 tau=2.0, threshold=0.5, *, key, dtype=jnp.float32):
        assert embed_dim % num_heads == 0
        self.embed_dim = embed_dim
        self.num_heads = num_heads
        self.scale = float(scale)        # Spikf_Block default passes scale=0.0; kept generic
        self.tau = float(tau)
        self.threshold = float(threshold)
        self.hidden = int(embed_dim * mlp_ratio)
        eps = 1e-5

        ks = list(jax.random.split(key, 20))
        pop = ks.pop

        def conv_weight(cin, cout):
            # PyTorch Conv1d weight is (cout, cin, 1); stored here as (cin, cout).
            return jax.random.normal(pop(), (cin, cout), dtype) / jnp.sqrt(float(cin))

        def bn_fold(c):
            gamma = 1.0 + 0.1 * jax.random.normal(pop(), (c,), dtype)
            beta = 0.1 * jax.random.normal(pop(), (c,), dtype)
            mean = jnp.zeros((c,), dtype)            # eval-mode running stats (defaults)
            var = jnp.ones((c,), dtype)
            s = gamma / jnp.sqrt(var + eps)
            return s, beta - mean * s

        C, Ch = embed_dim, self.hidden
        p = {}
        for name, cin, cout, has_bias in (("q", C, C, False), ("k", C, C, False),
                                          ("v", C, C, False), ("p", C, C, False),
                                          ("1", C, Ch, True), ("2", Ch, C, True)):
            w = conv_weight(cin, cout)
            cb = (0.1 * jax.random.normal(pop(), (cout,), dtype)) if has_bias \
                else jnp.zeros((cout,), dtype)
            s, b = bn_fold(cout)
            p["w" + name] = _q64(w * s[None, :])                  # BN scale folded into W
            p["b" + name] = _q64((cb * s + b).reshape(1, cout))   # conv bias folded thru BN
        self.params = p

    def __call__(self, x_tbcn):
        return spikf_block_forward(
            x_tbcn, self.params, num_heads=self.num_heads,
            scale=self.scale, tau=self.tau, threshold=self.threshold)


# ---------------------------------------------------------------------------
# Pure-JAX reference (same math, lax.scan over time) for correctness checking.
# ---------------------------------------------------------------------------
def _ref_forward(block, x_tbcn):
    p = block.params
    T, B, C, N = x_tbcn.shape
    H = block.num_heads
    d = C // H
    tau, thr, scale = block.tau, block.threshold, block.scale

    def lif(seq):                                  # seq: (T, B, N, F)
        def step(v, u):
            v = v + (u - v) / tau
            s = jnp.where(v >= thr, 1.0, 0.0)
            return v * (1.0 - s), s
        _, spikes = jax.lax.scan(step, jnp.zeros_like(seq[0]), seq)
        return spikes

    with jax.default_matmul_precision("float32"):
        x = jnp.transpose(x_tbcn, (0, 1, 3, 2))    # (T, B, N, C)

        def proj(z, w, b):
            return jnp.einsum("tbnc,cf->tbnf", z, w) + b

        q = lif(proj(x, p["wq"], p["bq"]))
        k = lif(proj(x, p["wk"], p["bk"]))
        v = lif(proj(x, p["wv"], p["bv"]))

        qh = q.reshape(T, B, N, H, d)
        kh = k.reshape(T, B, N, H, d)
        vh = v.reshape(T, B, N, H, d)
        attn = jnp.einsum("tbnhd,tbmhd->tbhnm", qh, kh) * scale
        r = jnp.einsum("tbhnm,tbmhd->tbnhd", attn, vh) * scale
        r = r.reshape(T, B, N, C)

        r_s = lif(r)
        attn_out = lif(proj(r_s, p["wp"], p["bp"]))
        x1 = x + attn_out

        h_s = lif(proj(x1, p["w1"], p["b1"]))
        m_s = lif(proj(h_s, p["w2"], p["b2"]))
        out = x1 + m_s

    return jnp.transpose(out, (0, 1, 3, 2))        # back to (T, B, C, N)


if __name__ == "__main__":
    key = jax.random.PRNGKey(0)
    k_params, k_x = jax.random.split(key)

    # Small shapes implied by the forward: x is (T=step, B, C=embed_dim, N=tokens).
    T, B, C, N = 4, 2, 32, 16
    block = SpikfBlockPallas(embed_dim=C, num_heads=4, mlp_ratio=4.0,
                             scale=0.25, key=k_params)

    # Spiking-network style binary event input (DVS-like), deterministic.
    x = (jax.random.uniform(k_x, (T, B, C, N)) < 0.5).astype(jnp.float32)

    out = jax.block_until_ready(block(x))
    ref = jax.block_until_ready(_ref_forward(block, x))

    assert out.shape == (T, B, C, N)
    assert jnp.allclose(out, ref, atol=1e-4, rtol=1e-4), \
        "Pallas output mismatch vs reference"

    print("KERNEL_OK")
</pallas_src>

<mosaic_0001>
module attributes {stable_mosaic.version = 11 : i64} {
  func.func @_spikf_block_kernel(%arg0: i32, %arg1: i32, %arg2: memref<1x1x16x32xf32, #tpu.memory_space<vmem>>, %arg3: memref<32x32xf32, #tpu.memory_space<vmem>>, %arg4: memref<1x32xf32, #tpu.memory_space<vmem>>, %arg5: memref<32x32xf32, #tpu.memory_space<vmem>>, %arg6: memref<1x32xf32, #tpu.memory_space<vmem>>, %arg7: memref<32x32xf32, #tpu.memory_space<vmem>>, %arg8: memref<1x32xf32, #tpu.memory_space<vmem>>, %arg9: memref<32x32xf32, #tpu.memory_space<vmem>>, %arg10: memref<1x32xf32, #tpu.memory_space<vmem>>, %arg11: memref<32x128xf32, #tpu.memory_space<vmem>>, %arg12: memref<1x128xf32, #tpu.memory_space<vmem>>, %arg13: memref<128x32xf32, #tpu.memory_space<vmem>>, %arg14: memref<1x32xf32, #tpu.memory_space<vmem>>, %arg15: memref<1x1x16x32xf32, #tpu.memory_space<vmem>>, %arg16: memref<16x32xf32, #tpu.memory_space<vmem>>, %arg17: memref<16x32xf32, #tpu.memory_space<vmem>>, %arg18: memref<16x32xf32, #tpu.memory_space<vmem>>, %arg19: memref<16x32xf32, #tpu.memory_space<vmem>>, %arg20: memref<16x32xf32, #tpu.memory_space<vmem>>, %arg21: memref<16x128xf32, #tpu.memory_space<vmem>>, %arg22: memref<16x32xf32, #tpu.memory_space<vmem>>) attributes {dimension_semantics = [#tpu.dimension_semantics<parallel>, #tpu.dimension_semantics<arbitrary>], iteration_bounds = array<i64: 2, 4>, scalar_prefetch = 0 : i64, scratch_operands = 7 : i64, tpu.core_type = #tpu.core_type<tc>, window_params = [{transform_indices = @transform_0, window_bounds = array<i64: 1, 1, 16, 32>}, {pipeline_mode = #tpu.pipeline_mode<synchronous>, transform_indices = @transform_1, window_bounds = array<i64: 32, 32>}, {pipeline_mode = #tpu.pipeline_mode<synchronous>, transform_indices = @transform_2, window_bounds = array<i64: 1, 32>}, {pipeline_mode = #tpu.pipeline_mode<synchronous>, transform_indices = @transform_3, window_bounds = array<i64: 32, 32>}, {pipeline_mode = #tpu.pipeline_mode<synchronous>, transform_indices = @transform_4, window_bounds = array<i64: 1, 32>}, {pipeline_mode = #tpu.pipeline_mode<synchronous>, transform_indices = @transform_5, window_bounds = array<i64: 32, 32>}, {pipeline_mode = #tpu.pipeline_mode<synchronous>, transform_indices = @transform_6, window_bounds = array<i64: 1, 32>}, {pipeline_mode = #tpu.pipeline_mode<synchronous>, transform_indices = @transform_7, window_bounds = array<i64: 32, 32>}, {pipeline_mode = #tpu.pipeline_mode<synchronous>, transform_indices = @transform_8, window_bounds = array<i64: 1, 32>}, {pipeline_mode = #tpu.pipeline_mode<synchronous>, transform_indices = @transform_9, window_bounds = array<i64: 32, 128>}, {pipeline_mode = #tpu.pipeline_mode<synchronous>, transform_indices = @transform_10, window_bounds = array<i64: 1, 128>}, {pipeline_mode = #tpu.pipeline_mode<synchronous>, transform_indices = @transform_11, window_bounds = array<i64: 128, 32>}, {pipeline_mode = #tpu.pipeline_mode<synchronous>, transform_indices = @transform_12, window_bounds = array<i64: 1, 32>}, {transform_indices = @transform_13, window_bounds = array<i64: 1, 1, 16, 32>}]} {
    %c0_i32 = arith.constant 0 : i32
    %0 = arith.cmpi eq, %arg1, %c0_i32 : i32
    %1 = arith.extui %0 : i1 to i32
    %c0_i32_0 = arith.constant 0 : i32
    %2 = arith.cmpi ne, %1, %c0_i32_0 : i32
    scf.if %2 {
      %cst_116 = arith.constant 0.000000e+00 : f32
      %175 = vector.broadcast %cst_116 : f32 to vector<16x32xf32>
      %c0_117 = arith.constant 0 : index
      %c0_118 = arith.constant 0 : index
      %176 = vector.load %arg16[%c0_117, %c0_118] : memref<16x32xf32, #tpu.memory_space<vmem>>, vector<16x32xf32>
      tpu.vector_store %arg16[%c0_117, %c0_118], %175 {strides = array<i32>} : memref<16x32xf32, #tpu.memory_space<vmem>>, vector<16x32xf32>,
      %cst_119 = arith.constant 0.000000e+00 : f32
      %177 = vector.broadcast %cst_119 : f32 to vector<16x32xf32>
      %c0_120 = arith.constant 0 : index
      %c0_121 = arith.constant 0 : index
      %178 = vector.load %arg17[%c0_120, %c0_121] : memref<16x32xf32, #tpu.memory_space<vmem>>, vector<16x32xf32>
      tpu.vector_store %arg17[%c0_120, %c0_121], %177 {strides = array<i32>} : memref<16x32xf32, #tpu.memory_space<vmem>>, vector<16x32xf32>,
      %cst_122 = arith.constant 0.000000e+00 : f32
      %179 = vector.broadcast %cst_122 : f32 to vector<16x32xf32>
      %c0_123 = arith.constant 0 : index
      %c0_124 = arith.constant 0 : index
      %180 = vector.load %arg18[%c0_123, %c0_124] : memref<16x32xf32, #tpu.memory_space<vmem>>, vector<16x32xf32>
      tpu.vector_store %arg18[%c0_123, %c0_124], %179 {strides = array<i32>} : memref<16x32xf32, #tpu.memory_space<vmem>>, vector<16x32xf32>,
      %cst_125 = arith.constant 0.000000e+00 : f32
      %181 = vector.broadcast %cst_125 : f32 to vector<16x32xf32>
      %c0_126 = arith.constant 0 : index
      %c0_127 = arith.constant 0 : index
      %182 = vector.load %arg19[%c0_126, %c0_127] : memref<16x32xf32, #tpu.memory_space<vmem>>, vector<16x32xf32>
      tpu.vector_store %arg19[%c0_126, %c0_127], %181 {strides = array<i32>} : memref<16x32xf32, #tpu.memory_space<vmem>>, vector<16x32xf32>,
      %cst_128 = arith.constant 0.000000e+00 : f32
      %183 = vector.broadcast %cst_128 : f32 to vector<16x32xf32>
      %c0_129 = arith.constant 0 : index
      %c0_130 = arith.constant 0 : index
      %184 = vector.load %arg20[%c0_129, %c0_130] : memref<16x32xf32, #tpu.memory_space<vmem>>, vector<16x32xf32>
      tpu.vector_store %arg20[%c0_129, %c0_130], %183 {strides = array<i32>} : memref<16x32xf32, #tpu.memory_space<vmem>>, vector<16x32xf32>,
      %cst_131 = arith.constant 0.000000e+00 : f32
      %185 = vector.broadcast %cst_131 : f32 to vector<16x128xf32>
      %c0_132 = arith.constant 0 : index
      %c0_133 = arith.constant 0 : index
      %186 = vector.load %arg21[%c0_132, %c0_133] : memref<16x128xf32, #tpu.memory_space<vmem>>, vector<16x128xf32>
      tpu.vector_store %arg21[%c0_132, %c0_133], %185 {strides = array<i32>} : memref<16x128xf32, #tpu.memory_space<vmem>>, vector<16x128xf32>,
      %cst_134 = arith.constant 0.000000e+00 : f32
      %187 = vector.broadcast %cst_134 : f32 to vector<16x32xf32>
      %c0_135 = arith.constant 0 : index
      %c0_136 = arith.constant 0 : index
      %188 = vector.load %arg22[%c0_135, %c0_136] : memref<16x32xf32, #tpu.memory_space<vmem>>, vector<16x32xf32>
      tpu.vector_store %arg22[%c0_135, %c0_136], %187 {strides = array<i32>} : memref<16x32xf32, #tpu.memory_space<vmem>>, vector<16x32xf32>,
    } else {
    }
    %c0 = arith.constant 0 : index
    %c0_1 = arith.constant 0 : index
    %c0_2 = arith.constant 0 : index
    %c0_3 = arith.constant 0 : index
    %3 = vector.load %arg2[%c0, %c0_1, %c0_2, %c0_3] : memref<1x1x16x32xf32, #tpu.memory_space<vmem>>, vector<1x1x16x32xf32>
    %4 = vector.shape_cast %3 : vector<1x1x16x32xf32> to vector<16x32xf32>
    %c0_4 = arith.constant 0 : index
    %c0_5 = arith.constant 0 : index
    %5 = vector.load %arg3[%c0_4, %c0_5] : memref<32x32xf32, #tpu.memory_space<vmem>>, vector<32x32xf32>
    %cst = arith.constant dense<0.000000e+00> : vector<16x32xf32>
    %6 = tpu.matmul %4, %5, %cst {dimension_numbers = #tpu.dot_dimension_numbers<[1], [0], [0], [1], [0, 0, 1, 1], [], []>} : vector<16x32xf32>, vector<32x32xf32>, vector<16x32xf32> -> vector<16x32xf32>
    %c0_6 = arith.constant 0 : index
    %c0_7 = arith.constant 0 : index
    %7 = vector.load %arg4[%c0_6, %c0_7] : memref<1x32xf32, #tpu.memory_space<vmem>>, vector<1x32xf32>
    %8 = vector.broadcast %7 : vector<1x32xf32> to vector<16x32xf32>
    %9 = arith.addf %6, %8 : vector<16x32xf32>
    %c0_8 = arith.constant 0 : index
    %c0_9 = arith.constant 0 : index
    %10 = vector.load %arg16[%c0_8, %c0_9] : memref<16x32xf32, #tpu.memory_space<vmem>>, vector<16x32xf32>
    %11 = arith.subf %9, %10 : vector<16x32xf32>
    %cst_10 = arith.constant 5.000000e-01 : f32
    %12 = vector.broadcast %cst_10 : f32 to vector<16x32xf32>
    %13 = arith.mulf %11, %12 : vector<16x32xf32>
    %14 = arith.addf %10, %13 : vector<16x32xf32>
    %cst_11 = arith.constant 5.000000e-01 : f32
    %15 = vector.broadcast %cst_11 : f32 to vector<16x32xf32>
    %16 = arith.cmpf oge, %14, %15 : vector<16x32xf32>
    %cst_12 = arith.constant 1.000000e+00 : f32
    %cst_13 = arith.constant 0.000000e+00 : f32
    %17 = vector.broadcast %cst_12 : f32 to vector<16x32xf32>
    %18 = vector.broadcast %cst_13 : f32 to vector<16x32xf32>
    %19 = arith.select %16, %17, %18 : vector<16x32xi1>, vector<16x32xf32>
    %cst_14 = arith.constant 1.000000e+00 : f32
    %20 = vector.broadcast %cst_14 : f32 to vector<16x32xf32>
    %21 = arith.subf %20, %19 : vector<16x32xf32>
    %22 = arith.mulf %14, %21 : vector<16x32xf32>
    %c0_15 = arith.constant 0 : index
    %c0_16 = arith.constant 0 : index
    %23 = vector.load %arg16[%c0_15, %c0_16] : memref<16x32xf32, #tpu.memory_space<vmem>>, vector<16x32xf32>
    tpu.vector_store %arg16[%c0_15, %c0_16], %22 {strides = array<i32>} : memref<16x32xf32, #tpu.memory_space<vmem>>, vector<16x32xf32>,
    %c0_17 = arith.constant 0 : index
    %c0_18 = arith.constant 0 : index
    %24 = vector.load %arg5[%c0_17, %c0_18] : memref<32x32xf32, #tpu.memory_space<vmem>>, vector<32x32xf32>
    %cst_19 = arith.constant dense<0.000000e+00> : vector<16x32xf32>
    %25 = tpu.matmul %4, %24, %cst_19 {dimension_numbers = #tpu.dot_dimension_numbers<[1], [0], [0], [1], [0, 0, 1, 1], [], []>} : vector<16x32xf32>, vector<32x32xf32>, vector<16x32xf32> -> vector<16x32xf32>
    %c0_20 = arith.constant 0 : index
    %c0_21 = arith.constant 0 : index
    %26 = vector.load %arg6[%c0_20, %c0_21] : memref<1x32xf32, #tpu.memory_space<vmem>>, vector<1x32xf32>
    %27 = vector.broadcast %26 : vector<1x32xf32> to vector<16x32xf32>
    %28 = arith.addf %25, %27 : vector<16x32xf32>
    %c0_22 = arith.constant 0 : index
    %c0_23 = arith.constant 0 : index
    %29 = vector.load %arg17[%c0_22, %c0_23] : memref<16x32xf32, #tpu.memory_space<vmem>>, vector<16x32xf32>
    %30 = arith.subf %28, %29 : vector<16x32xf32>
    %cst_24 = arith.constant 5.000000e-01 : f32
    %31 = vector.broadcast %cst_24 : f32 to vector<16x32xf32>
    %32 = arith.mulf %30, %31 : vector<16x32xf32>
    %33 = arith.addf %29, %32 : vector<16x32xf32>
    %cst_25 = arith.constant 5.000000e-01 : f32
    %34 = vector.broadcast %cst_25 : f32 to vector<16x32xf32>
    %35 = arith.cmpf oge, %33, %34 : vector<16x32xf32>
    %cst_26 = arith.constant 1.000000e+00 : f32
    %cst_27 = arith.constant 0.000000e+00 : f32
    %36 = vector.broadcast %cst_26 : f32 to vector<16x32xf32>
    %37 = vector.broadcast %cst_27 : f32 to vector<16x32xf32>
    %38 = arith.select %35, %36, %37 : vector<16x32xi1>, vector<16x32xf32>
    %cst_28 = arith.constant 1.000000e+00 : f32
    %39 = vector.broadcast %cst_28 : f32 to vector<16x32xf32>
    %40 = arith.subf %39, %38 : vector<16x32xf32>
    %41 = arith.mulf %33, %40 : vector<16x32xf32>
    %c0_29 = arith.constant 0 : index
    %c0_30 = arith.constant 0 : index
    %42 = vector.load %arg17[%c0_29, %c0_30] : memref<16x32xf32, #tpu.memory_space<vmem>>, vector<16x32xf32>
    tpu.vector_store %arg17[%c0_29, %c0_30], %41 {strides = array<i32>} : memref<16x32xf32, #tpu.memory_space<vmem>>, vector<16x32xf32>,
    %c0_31 = arith.constant 0 : index
    %c0_32 = arith.constant 0 : index
    %43 = vector.load %arg7[%c0_31, %c0_32] : memref<32x32xf32, #tpu.memory_space<vmem>>, vector<32x32xf32>
    %cst_33 = arith.constant dense<0.000000e+00> : vector<16x32xf32>
    %44 = tpu.matmul %4, %43, %cst_33 {dimension_numbers = #tpu.dot_dimension_numbers<[1], [0], [0], [1], [0, 0, 1, 1], [], []>} : vector<16x32xf32>, vector<32x32xf32>, vector<16x32xf32> -> vector<16x32xf32>
    %c0_34 = arith.constant 0 : index
    %c0_35 = arith.constant 0 : index
    %45 = vector.load %arg8[%c0_34, %c0_35] : memref<1x32xf32, #tpu.memory_space<vmem>>, vector<1x32xf32>
    %46 = vector.broadcast %45 : vector<1x32xf32> to vector<16x32xf32>
    %47 = arith.addf %44, %46 : vector<16x32xf32>
    %c0_36 = arith.constant 0 : index
    %c0_37 = arith.constant 0 : index
    %48 = vector.load %arg18[%c0_36, %c0_37] : memref<16x32xf32, #tpu.memory_space<vmem>>, vector<16x32xf32>
    %49 = arith.subf %47, %48 : vector<16x32xf32>
    %cst_38 = arith.constant 5.000000e-01 : f32
    %50 = vector.broadcast %cst_38 : f32 to vector<16x32xf32>
    %51 = arith.mulf %49, %50 : vector<16x32xf32>
    %52 = arith.addf %48, %51 : vector<16x32xf32>
    %cst_39 = arith.constant 5.000000e-01 : f32
    %53 = vector.broadcast %cst_39 : f32 to vector<16x32xf32>
    %54 = arith.cmpf oge, %52, %53 : vector<16x32xf32>
    %cst_40 = arith.constant 1.000000e+00 : f32
    %cst_41 = arith.constant 0.000000e+00 : f32
    %55 = vector.broadcast %cst_40 : f32 to vector<16x32xf32>
    %56 = vector.broadcast %cst_41 : f32 to vector<16x32xf32>
    %57 = arith.select %54, %55, %56 : vector<16x32xi1>, vector<16x32xf32>
    %cst_42 = arith.constant 1.000000e+00 : f32
    %58 = vector.broadcast %cst_42 : f32 to vector<16x32xf32>
    %59 = arith.subf %58, %57 : vector<16x32xf32>
    %60 = arith.mulf %52, %59 : vector<16x32xf32>
    %c0_43 = arith.constant 0 : index
    %c0_44 = arith.constant 0 : index
    %61 = vector.load %arg18[%c0_43, %c0_44] : memref<16x32xf32, #tpu.memory_space<vmem>>, vector<16x32xf32>
    tpu.vector_store %arg18[%c0_43, %c0_44], %60 {strides = array<i32>} : memref<16x32xf32, #tpu.memory_space<vmem>>, vector<16x32xf32>,
    %62 = vector.extract_strided_slice %19 {offsets = [0, 0], sizes = [16, 8], strides = [1, 1]} : vector<16x32xf32> to vector<16x8xf32>
    %63 = vector.extract_strided_slice %38 {offsets = [0, 0], sizes = [16, 8], strides = [1, 1]} : vector<16x32xf32> to vector<16x8xf32>
    %64 = vector.extract_strided_slice %57 {offsets = [0, 0], sizes = [16, 8], strides = [1, 1]} : vector<16x32xf32> to vector<16x8xf32>
    "tpu.trace_start"() <{level = 10 : i32, message = "nd,md->nm"}> : () -> ()
    %cst_45 = arith.constant dense<0.000000e+00> : vector<16x16xf32>
    %65 = tpu.matmul %62, %63, %cst_45 {dimension_numbers = #tpu.dot_dimension_numbers<[1], [1], [0], [0], [0, 0, 1, 0], [], []>} : vector<16x8xf32>, vector<16x8xf32>, vector<16x16xf32> -> vector<16x16xf32>
    "tpu.trace_stop"() : () -> ()
    %cst_46 = arith.constant 2.500000e-01 : f32
    %66 = vector.broadcast %cst_46 : f32 to vector<16x16xf32>
    %67 = arith.mulf %65, %66 : vector<16x16xf32>
    %cst_47 = arith.constant dense<0.000000e+00> : vector<16x8xf32>
    %68 = tpu.matmul %67, %64, %cst_47 {dimension_numbers = #tpu.dot_dimension_numbers<[1], [0], [0], [1], [0, 0, 1, 1], [], []>} : vector<16x16xf32>, vector<16x8xf32>, vector<16x8xf32> -> vector<16x8xf32>
    %cst_48 = arith.constant 2.500000e-01 : f32
    %69 = vector.broadcast %cst_48 : f32 to vector<16x8xf32>
    %70 = arith.mulf %68, %69 : vector<16x8xf32>
    %71 = vector.extract_strided_slice %19 {offsets = [0, 8], sizes = [16, 8], strides = [1, 1]} : vector<16x32xf32> to vector<16x8xf32>
    %72 = vector.extract_strided_slice %38 {offsets = [0, 8], sizes = [16, 8], strides = [1, 1]} : vector<16x32xf32> to vector<16x8xf32>
    %73 = vector.extract_strided_slice %57 {offsets = [0, 8], sizes = [16, 8], strides = [1, 1]} : vector<16x32xf32> to vector<16x8xf32>
    "tpu.trace_start"() <{level = 10 : i32, message = "nd,md->nm"}> : () -> ()
    %cst_49 = arith.constant dense<0.000000e+00> : vector<16x16xf32>
    %74 = tpu.matmul %71, %72, %cst_49 {dimension_numbers = #tpu.dot_dimension_numbers<[1], [1], [0], [0], [0, 0, 1, 0], [], []>} : vector<16x8xf32>, vector<16x8xf32>, vector<16x16xf32> -> vector<16x16xf32>
    "tpu.trace_stop"() : () -> ()
    %cst_50 = arith.constant 2.500000e-01 : f32
    %75 = vector.broadcast %cst_50 : f32 to vector<16x16xf32>
    %76 = arith.mulf %74, %75 : vector<16x16xf32>
    %cst_51 = arith.constant dense<0.000000e+00> : vector<16x8xf32>
    %77 = tpu.matmul %76, %73, %cst_51 {dimension_numbers = #tpu.dot_dimension_numbers<[1], [0], [0], [1], [0, 0, 1, 1], [], []>} : vector<16x16xf32>, vector<16x8xf32>, vector<16x8xf32> -> vector<16x8xf32>
    %cst_52 = arith.constant 2.500000e-01 : f32
    %78 = vector.broadcast %cst_52 : f32 to vector<16x8xf32>
    %79 = arith.mulf %77, %78 : vector<16x8xf32>
    %80 = vector.extract_strided_slice %19 {offsets = [0, 16], sizes = [16, 8], strides = [1, 1]} : vector<16x32xf32> to vector<16x8xf32>
    %81 = vector.extract_strided_slice %38 {offsets = [0, 16], sizes = [16, 8], strides = [1, 1]} : vector<16x32xf32> to vector<16x8xf32>
    %82 = vector.extract_strided_slice %57 {offsets = [0, 16], sizes = [16, 8], strides = [1, 1]} : vector<16x32xf32> to vector<16x8xf32>
    "tpu.trace_start"() <{level = 10 : i32, message = "nd,md->nm"}> : () -> ()
    %cst_53 = arith.constant dense<0.000000e+00> : vector<16x16xf32>
    %83 = tpu.matmul %80, %81, %cst_53 {dimension_numbers = #tpu.dot_dimension_numbers<[1], [1], [0], [0], [0, 0, 1, 0], [], []>} : vector<16x8xf32>, vector<16x8xf32>, vector<16x16xf32> -> vector<16x16xf32>
    "tpu.trace_stop"() : () -> ()
    %cst_54 = arith.constant 2.500000e-01 : f32
    %84 = vector.broadcast %cst_54 : f32 to vector<16x16xf32>
    %85 = arith.mulf %83, %84 : vector<16x16xf32>
    %cst_55 = arith.constant dense<0.000000e+00> : vector<16x8xf32>
    %86 = tpu.matmul %85, %82, %cst_55 {dimension_numbers = #tpu.dot_dimension_numbers<[1], [0], [0], [1], [0, 0, 1, 1], [], []>} : vector<16x16xf32>, vector<16x8xf32>, vector<16x8xf32> -> vector<16x8xf32>
    %cst_56 = arith.constant 2.500000e-01 : f32
    %87 = vector.broadcast %cst_56 : f32 to vector<16x8xf32>
    %88 = arith.mulf %86, %87 : vector<16x8xf32>
    %89 = vector.extract_strided_slice %19 {offsets = [0, 24], sizes = [16, 8], strides = [1, 1]} : vector<16x32xf32> to vector<16x8xf32>
    %90 = vector.extract_strided_slice %38 {offsets = [0, 24], sizes = [16, 8], strides = [1, 1]} : vector<16x32xf32> to vector<16x8xf32>
    %91 = vector.extract_strided_slice %57 {offsets = [0, 24], sizes = [16, 8], strides = [1, 1]} : vector<16x32xf32> to vector<16x8xf32>
    "tpu.trace_start"() <{level = 10 : i32, message = "nd,md->nm"}> : () -> ()
    %cst_57 = arith.constant dense<0.000000e+00> : vector<16x16xf32>
    %92 = tpu.matmul %89, %90, %cst_57 {dimension_numbers = #tpu.dot_dimension_numbers<[1], [1], [0], [0], [0, 0, 1, 0], [], []>} : vector<16x8xf32>, vector<16x8xf32>, vector<16x16xf32> -> vector<16x16xf32>
    "tpu.trace_stop"() : () -> ()
    %cst_58 = arith.constant 2.500000e-01 : f32
    %93 = vector.broadcast %cst_58 : f32 to vector<16x16xf32>
    %94 = arith.mulf %92, %93 : vector<16x16xf32>
    %cst_59 = arith.constant dense<0.000000e+00> : vector<16x8xf32>
    %95 = tpu.matmul %94, %91, %cst_59 {dimension_numbers = #tpu.dot_dimension_numbers<[1], [0], [0], [1], [0, 0, 1, 1], [], []>} : vector<16x16xf32>, vector<16x8xf32>, vector<16x8xf32> -> vector<16x8xf32>
    %cst_60 = arith.constant 2.500000e-01 : f32
    %96 = vector.broadcast %cst_60 : f32 to vector<16x8xf32>
    %97 = arith.mulf %95, %96 : vector<16x8xf32>
    %98 = tpu.concatenate %70, %79, %88, %97 in 1 : vector<16x8xf32>, vector<16x8xf32>, vector<16x8xf32>, vector<16x8xf32> -> vector<16x32xf32>
    %c0_61 = arith.constant 0 : index
    %c0_62 = arith.constant 0 : index
    %99 = vector.load %arg19[%c0_61, %c0_62] : memref<16x32xf32, #tpu.memory_space<vmem>>, vector<16x32xf32>
    %100 = arith.subf %98, %99 : vector<16x32xf32>
    %cst_63 = arith.constant 5.000000e-01 : f32
    %101 = vector.broadcast %cst_63 : f32 to vector<16x32xf32>
    %102 = arith.mulf %100, %101 : vector<16x32xf32>
    %103 = arith.addf %99, %102 : vector<16x32xf32>
    %cst_64 = arith.constant 5.000000e-01 : f32
    %104 = vector.broadcast %cst_64 : f32 to vector<16x32xf32>
    %105 = arith.cmpf oge, %103, %104 : vector<16x32xf32>
    %cst_65 = arith.constant 1.000000e+00 : f32
    %cst_66 = arith.constant 0.000000e+00 : f32
    %106 = vector.broadcast %cst_65 : f32 to vector<16x32xf32>
    %107 = vector.broadcast %cst_66 : f32 to vector<16x32xf32>
    %108 = arith.select %105, %106, %107 : vector<16x32xi1>, vector<16x32xf32>
    %cst_67 = arith.constant 1.000000e+00 : f32
    %109 = vector.broadcast %cst_67 : f32 to vector<16x32xf32>
    %110 = arith.subf %109, %108 : vector<16x32xf32>
    %111 = arith.mulf %103, %110 : vector<16x32xf32>
    %c0_68 = arith.constant 0 : index
    %c0_69 = arith.constant 0 : index
    %112 = vector.load %arg19[%c0_68, %c0_69] : memref<16x32xf32, #tpu.memory_space<vmem>>, vector<16x32xf32>
    tpu.vector_store %arg19[%c0_68, %c0_69], %111 {strides = array<i32>} : memref<16x32xf32, #tpu.memory_space<vmem>>, vector<16x32xf32>,
    %c0_70 = arith.constant 0 : index
    %c0_71 = arith.constant 0 : index
    %113 = vector.load %arg9[%c0_70, %c0_71] : memref<32x32xf32, #tpu.memory_space<vmem>>, vector<32x32xf32>
    %cst_72 = arith.constant dense<0.000000e+00> : vector<16x32xf32>
    %114 = tpu.matmul %108, %113, %cst_72 {dimension_numbers = #tpu.dot_dimension_numbers<[1], [0], [0], [1], [0, 0, 1, 1], [], []>} : vector<16x32xf32>, vector<32x32xf32>, vector<16x32xf32> -> vector<16x32xf32>
    %c0_73 = arith.constant 0 : index
    %c0_74 = arith.constant 0 : index
    %115 = vector.load %arg10[%c0_73, %c0_74] : memref<1x32xf32, #tpu.memory_space<vmem>>, vector<1x32xf32>
    %116 = vector.broadcast %115 : vector<1x32xf32> to vector<16x32xf32>
    %117 = arith.addf %114, %116 : vector<16x32xf32>
    %c0_75 = arith.constant 0 : index
    %c0_76 = arith.constant 0 : index
    %118 = vector.load %arg20[%c0_75, %c0_76] : memref<16x32xf32, #tpu.memory_space<vmem>>, vector<16x32xf32>
    %119 = arith.subf %117, %118 : vector<16x32xf32>
    %cst_77 = arith.constant 5.000000e-01 : f32
    %120 = vector.broadcast %cst_77 : f32 to vector<16x32xf32>
    %121 = arith.mulf %119, %120 : vector<16x32xf32>
    %122 = arith.addf %118, %121 : vector<16x32xf32>
    %cst_78 = arith.constant 5.000000e-01 : f32
    %123 = vector.broadcast %cst_78 : f32 to vector<16x32xf32>
    %124 = arith.cmpf oge, %122, %123 : vector<16x32xf32>
    %cst_79 = arith.constant 1.000000e+00 : f32
    %cst_80 = arith.constant 0.000000e+00 : f32
    %125 = vector.broadcast %cst_79 : f32 to vector<16x32xf32>
    %126 = vector.broadcast %cst_80 : f32 to vector<16x32xf32>
    %127 = arith.select %124, %125, %126 : vector<16x32xi1>, vector<16x32xf32>
    %cst_81 = arith.constant 1.000000e+00 : f32
    %128 = vector.broadcast %cst_81 : f32 to vector<16x32xf32>
    %129 = arith.subf %128, %127 : vector<16x32xf32>
    %130 = arith.mulf %122, %129 : vector<16x32xf32>
    %c0_82 = arith.constant 0 : index
    %c0_83 = arith.constant 0 : index
    %131 = vector.load %arg20[%c0_82, %c0_83] : memref<16x32xf32, #tpu.memory_space<vmem>>, vector<16x32xf32>
    tpu.vector_store %arg20[%c0_82, %c0_83], %130 {strides = array<i32>} : memref<16x32xf32, #tpu.memory_space<vmem>>, vector<16x32xf32>,
    %132 = arith.addf %4, %127 : vector<16x32xf32>
    %c0_84 = arith.constant 0 : index
    %c0_85 = arith.constant 0 : index
    %133 = vector.load %arg11[%c0_84, %c0_85] : memref<32x128xf32, #tpu.memory_space<vmem>>, vector<32x128xf32>
    %cst_86 = arith.constant dense<0.000000e+00> : vector<16x128xf32>
    %134 = tpu.matmul %132, %133, %cst_86 {dimension_numbers = #tpu.dot_dimension_numbers<[1], [0], [0], [1], [0, 0, 1, 1], [], []>} : vector<16x32xf32>, vector<32x128xf32>, vector<16x128xf32> -> vector<16x128xf32>
    %c0_87 = arith.constant 0 : index
    %c0_88 = arith.constant 0 : index
    %135 = vector.load %arg12[%c0_87, %c0_88] : memref<1x128xf32, #tpu.memory_space<vmem>>, vector<1x128xf32>
    %136 = vector.broadcast %135 : vector<1x128xf32> to vector<16x128xf32>
    %137 = arith.addf %134, %136 : vector<16x128xf32>
    %c0_89 = arith.constant 0 : index
    %c0_90 = arith.constant 0 : index
    %138 = vector.load %arg21[%c0_89, %c0_90] : memref<16x128xf32, #tpu.memory_space<vmem>>, vector<16x128xf32>
    %139 = arith.subf %137, %138 : vector<16x128xf32>
    %cst_91 = arith.constant 5.000000e-01 : f32
    %140 = vector.broadcast %cst_91 : f32 to vector<16x128xf32>
    %141 = arith.mulf %139, %140 : vector<16x128xf32>
    %142 = arith.addf %138, %141 : vector<16x128xf32>
    %cst_92 = arith.constant 5.000000e-01 : f32
    %143 = vector.broadcast %cst_92 : f32 to vector<16x128xf32>
    %144 = arith.cmpf oge, %142, %143 : vector<16x128xf32>
    %cst_93 = arith.constant 1.000000e+00 : f32
    %cst_94 = arith.constant 0.000000e+00 : f32
    %145 = vector.broadcast %cst_93 : f32 to vector<16x128xf32>
    %146 = vector.broadcast %cst_94 : f32 to vector<16x128xf32>
    %147 = arith.select %144, %145, %146 : vector<16x128xi1>, vector<16x128xf32>
    %cst_95 = arith.constant 1.000000e+00 : f32
    %148 = vector.broadcast %cst_95 : f32 to vector<16x128xf32>
    %149 = arith.subf %148, %147 : vector<16x128xf32>
    %150 = arith.mulf %142, %149 : vector<16x128xf32>
    %c0_96 = arith.constant 0 : index
    %c0_97 = arith.constant 0 : index
    %151 = vector.load %arg21[%c0_96, %c0_97] : memref<16x128xf32, #tpu.memory_space<vmem>>, vector<16x128xf32>
    tpu.vector_store %arg21[%c0_96, %c0_97], %150 {strides = array<i32>} : memref<16x128xf32, #tpu.memory_space<vmem>>, vector<16x128xf32>,
    %c0_98 = arith.constant 0 : index
    %c0_99 = arith.constant 0 : index
    %152 = vector.load %arg13[%c0_98, %c0_99] : memref<128x32xf32, #tpu.memory_space<vmem>>, vector<128x32xf32>
    %cst_100 = arith.constant dense<0.000000e+00> : vector<16x32xf32>
    %153 = tpu.matmul %147, %152, %cst_100 {dimension_numbers = #tpu.dot_dimension_numbers<[1], [0], [0], [1], [0, 0, 1, 1], [], []>} : vector<16x128xf32>, vector<128x32xf32>, vector<16x32xf32> -> vector<16x32xf32>
    %c0_101 = arith.constant 0 : index
    %c0_102 = arith.constant 0 : index
    %154 = vector.load %arg14[%c0_101, %c0_102] : memref<1x32xf32, #tpu.memory_space<vmem>>, vector<1x32xf32>
    %155 = vector.broadcast %154 : vector<1x32xf32> to vector<16x32xf32>
    %156 = arith.addf %153, %155 : vector<16x32xf32>
    %c0_103 = arith.constant 0 : index
    %c0_104 = arith.constant 0 : index
    %157 = vector.load %arg22[%c0_103, %c0_104] : memref<16x32xf32, #tpu.memory_space<vmem>>, vector<16x32xf32>
    %158 = arith.subf %156, %157 : vector<16x32xf32>
    %cst_105 = arith.constant 5.000000e-01 : f32
    %159 = vector.broadcast %cst_105 : f32 to vector<16x32xf32>
    %160 = arith.mulf %158, %159 : vector<16x32xf32>
    %161 = arith.addf %157, %160 : vector<16x32xf32>
    %cst_106 = arith.constant 5.000000e-01 : f32
    %162 = vector.broadcast %cst_106 : f32 to vector<16x32xf32>
    %163 = arith.cmpf oge, %161, %162 : vector<16x32xf32>
    %cst_107 = arith.constant 1.000000e+00 : f32
    %cst_108 = arith.constant 0.000000e+00 : f32
    %164 = vector.broadcast %cst_107 : f32 to vector<16x32xf32>
    %165 = vector.broadcast %cst_108 : f32 to vector<16x32xf32>
    %166 = arith.select %163, %164, %165 : vector<16x32xi1>, vector<16x32xf32>
    %cst_109 = arith.constant 1.000000e+00 : f32
    %167 = vector.broadcast %cst_109 : f32 to vector<16x32xf32>
    %168 = arith.subf %167, %166 : vector<16x32xf32>
    %169 = arith.mulf %161, %168 : vector<16x32xf32>
    %c0_110 = arith.constant 0 : index
    %c0_111 = arith.constant 0 : index
    %170 = vector.load %arg22[%c0_110, %c0_111] : memref<16x32xf32, #tpu.memory_space<vmem>>, vector<16x32xf32>
    tpu.vector_store %arg22[%c0_110, %c0_111], %169 {strides = array<i32>} : memref<16x32xf32, #tpu.memory_space<vmem>>, vector<16x32xf32>,
    %171 = arith.addf %132, %166 : vector<16x32xf32>
    %c0_112 = arith.constant 0 : index
    %c0_113 = arith.constant 0 : index
    %c0_114 = arith.constant 0 : index
    %c0_115 = arith.constant 0 : index
    %172 = vector.load %arg15[%c0_112, %c0_113, %c0_114, %c0_115] : memref<1x1x16x32xf32, #tpu.memory_space<vmem>>, vector<1x1x16x32xf32>
    %173 = vector.shape_cast %172 : vector<1x1x16x32xf32> to vector<16x32xf32>
    %174 = vector.shape_cast %171 : vector<16x32xf32> to vector<1x1x16x32xf32>
    tpu.vector_store %arg15[%c0_112, %c0_113, %c0_114, %c0_115], %174 {strides = array<i32>} : memref<1x1x16x32xf32, #tpu.memory_space<vmem>>, vector<1x1x16x32xf32>,
    return
  }
  func.func @transform_0(%arg0: i32, %arg1: i32) -> (i32, i32, i32, i32) {
    %c0_i32 = arith.constant 0 : i32
    %c0_i32_0 = arith.constant 0 : i32
    %c0_i32_1 = arith.constant 0 : i32
    return %arg1, %arg0, %c0_i32, %c0_i32_0 : i32, i32, i32, i32
  }
  func.func @transform_1(%arg0: i32, %arg1: i32) -> (i32, i32) {
    %c0_i32 = arith.constant 0 : i32
    %c0_i32_0 = arith.constant 0 : i32
    %c0_i32_1 = arith.constant 0 : i32
    return %c0_i32, %c0_i32_0 : i32, i32
  }
  func.func @transform_2(%arg0: i32, %arg1: i32) -> (i32, i32) {
    %c0_i32 = arith.constant 0 : i32
    %c0_i32_0 = arith.constant 0 : i32
    %c0_i32_1 = arith.constant 0 : i32
    return %c0_i32, %c0_i32_0 : i32, i32
  }
  func.func @transform_3(%arg0: i32, %arg1: i32) -> (i32, i32) {
    %c0_i32 = arith.constant 0 : i32
    %c0_i32_0 = arith.constant 0 : i32
    %c0_i32_1 = arith.constant 0 : i32
    return %c0_i32, %c0_i32_0 : i32, i32
  }
  func.func @transform_4(%arg0: i32, %arg1: i32) -> (i32, i32) {
    %c0_i32 = arith.constant 0 : i32
    %c0_i32_0 = arith.constant 0 : i32
    %c0_i32_1 = arith.constant 0 : i32
    return %c0_i32, %c0_i32_0 : i32, i32
  }
  func.func @transform_5(%arg0: i32, %arg1: i32) -> (i32, i32) {
    %c0_i32 = arith.constant 0 : i32
    %c0_i32_0 = arith.constant 0 : i32
    %c0_i32_1 = arith.constant 0 : i32
    return %c0_i32, %c0_i32_0 : i32, i32
  }
  func.func @transform_6(%arg0: i32, %arg1: i32) -> (i32, i32) {
    %c0_i32 = arith.constant 0 : i32
    %c0_i32_0 = arith.constant 0 : i32
    %c0_i32_1 = arith.constant 0 : i32
    return %c0_i32, %c0_i32_0 : i32, i32
  }
  func.func @transform_7(%arg0: i32, %arg1: i32) -> (i32, i32) {
    %c0_i32 = arith.constant 0 : i32
    %c0_i32_0 = arith.constant 0 : i32
    %c0_i32_1 = arith.constant 0 : i32
    return %c0_i32, %c0_i32_0 : i32, i32
  }
  func.func @transform_8(%arg0: i32, %arg1: i32) -> (i32, i32) {
    %c0_i32 = arith.constant 0 : i32
    %c0_i32_0 = arith.constant 0 : i32
    %c0_i32_1 = arith.constant 0 : i32
    return %c0_i32, %c0_i32_0 : i32, i32
  }
  func.func @transform_9(%arg0: i32, %arg1: i32) -> (i32, i32) {
    %c0_i32 = arith.constant 0 : i32
    %c0_i32_0 = arith.constant 0 : i32
    %c0_i32_1 = arith.constant 0 : i32
    return %c0_i32, %c0_i32_0 : i32, i32
  }
  func.func @transform_10(%arg0: i32, %arg1: i32) -> (i32, i32) {
    %c0_i32 = arith.constant 0 : i32
    %c0_i32_0 = arith.constant 0 : i32
    %c0_i32_1 = arith.constant 0 : i32
    return %c0_i32, %c0_i32_0 : i32, i32
  }
  func.func @transform_11(%arg0: i32, %arg1: i32) -> (i32, i32) {
    %c0_i32 = arith.constant 0 : i32
    %c0_i32_0 = arith.constant 0 : i32
    %c0_i32_1 = arith.constant 0 : i32
    return %c0_i32, %c0_i32_0 : i32, i32
  }
  func.func @transform_12(%arg0: i32, %arg1: i32) -> (i32, i32) {
    %c0_i32 = arith.constant 0 : i32
    %c0_i32_0 = arith.constant 0 : i32
    %c0_i32_1 = arith.constant 0 : i32
    return %c0_i32, %c0_i32_0 : i32, i32
  }
  func.func @transform_13(%arg0: i32, %arg1: i32) -> (i32, i32, i32, i32) {
    %c0_i32 = arith.constant 0 : i32
    %c0_i32_0 = arith.constant 0 : i32
    %c0_i32_1 = arith.constant 0 : i32
    return %arg1, %arg0, %c0_i32, %c0_i32_0 : i32, i32, i32, i32
  }
}

</mosaic_0001>

<bundles_post_ra>
// kernel: tpu_custom_call.1
= control target key start
LH: loop header
LB: loop body
LE: loop exit
PB: predicated region body
PF: predicated region fallthrough
CT: control target
= control target key end

     0   :  { %s3277_s0 = inlined_call_operand.vmem [shape: f32[4,2,16,32], index: 0, kind: input, shape index: {}]   ;;  %s3278_s1 = inlined_call_operand.vmem [shape: f32[32,32], index: 1, kind: input, shape index: {}]   ;;  %s3279_s2 = inlined_call_operand.vmem [shape: f32[1,32], index: 2, kind: input, shape index: {}]   ;;  %s3280_s3 = inlined_call_operand.hbm [shape: f32[32,32], index: 3, kind: input, shape index: {}]   ;;  %s3281_s4 = inlined_call_operand.vmem [shape: f32[1,32], index: 4, kind: input, shape index: {}]   ;;  %s3282_s5 = inlined_call_operand.hbm [shape: f32[32,32], index: 5, kind: input, shape index: {}]   ;;  %s3283_s6 = inlined_call_operand.vmem [shape: f32[1,32], index: 6, kind: input, shape index: {}]   ;;  %s3284_s7 = inlined_call_operand.hbm [shape: f32[32,32], index: 7, kind: input, shape index: {}]   ;;  %s3285_s8 = inlined_call_operand.vmem [shape: f32[1,32], index: 8, kind: input, shape index: {}]   ;;  %s3286_s9 = inlined_call_operand.hbm [shape: f32[32,128], index: 9, kind: input, shape index: {}]   ;;  %s3287_s10 = inlined_call_operand.vmem [shape: f32[1,128], index: 10, kind: input, shape index: {}]   ;;  %s3288_s11 = inlined_call_operand.vmem [shape: f32[128,32], index: 11, kind: input, shape index: {}]   ;;  %s3289_s12 = inlined_call_operand.vmem [shape: f32[1,32], index: 12, kind: input, shape index: {}]   ;;  %s3290_s13 = inlined_call_operand.hbm [shape: f32[4,2,16,32], index: 13, kind: output, shape index: {}]  }
   0x1   :  { %3299 = sst [smem:[#allocation30_spill]] %s3290_s13 }
   0x2   :  { %18 = vsyncpa [#allocation10], 0 }
   0x3   :  { %19 = vsyncpa [#allocation13], 0 }
   0x4   :  { %20 = vsyncpa [#allocation16], 0 }
   0x5   :  { %21 = vsyncpa [#allocation11], 0 }
   0x6   :  { %23 = vsyncpa [#allocation11 + $0x1], 0  ;;  %s2851_s25 = smov 0   ;;  %s2853_s26 = smov 0  }
   0x7   :  { %s2855_s27 = smov 0   ;;  %s2857_s28 = smov 0  }
   0x8   :  { %s2859_s29 = smov 0   ;;  %s2861_s30 = smov 0  }
   0x9   :  { %s2863_s14 = smov 0   ;;  %s2865_s15 = smov 0  }
   0xa LB: > { %3300 = sst [smem:[#allocation22_spill]] %s2734_s25  ;;  %s2121_s16 = sadd.s32 4294967295, %s2762_s15   ;;  %s2762_s15 = sphi %s2865_s15, %s29_s15   ;;  %s2758_s14 = sphi %s2863_s14, %s3322_s14   ;;  %s2754_s30 = sphi %s2861_s30, %s3321_s30   ;;  %s2750_s29 = sphi %s2859_s29, %s3320_s29   ;;  %s2746_s28 = sphi %s2857_s28, %s3319_s28   ;;  %s2742_s27 = sphi %s2855_s27, %s3318_s27   ;;  %s2738_s26 = sphi %s2853_s26, %s3324_s26   ;;  %s2734_s25 = sphi %s2851_s25, %s3323_s25  }
   0xb   : > { %3301 = sst [smem:[#allocation23_spill]] %s2742_s27  ;;  %s2122_s17 = sadd.s32 4294967294, %s2762_s15  }
   0xc   : > { %3302 = sst [smem:[#allocation24_spill]] %s2754_s30  ;;  %s38_s18 = sadd.s32 1, %s2754_s30 }
   0xd   : > { %3303 = sst [smem:[#allocation25_spill]] %s2758_s14  ;;  %s41_s19 = sadd.s32 1, %s2758_s14 }
   0xe   : > { %p39_p0 = scmp.ge.s32.totalorder %s38_s18, 4  ;;  %s330_s20 = sadd.s32 1, %s2742_s27 }
   0xf   : > { %p340_p1 = scmp.ne.s32.totalorder %s2742_s27, %s2738_s26  ;;  %p341_p2 = scmp.eq.s32.totalorder %s2121_s16, 7 }
  0x10   : > { %s3326_s18 = smov (%p39_p0, %s38_s18), 0  ;;  %s3328_s19 = smov (!%p39_p0, %s41_s19), %s2758_s14 }
  0x11   : > { %3304 = sst [smem:[#allocation26_spill]] %s3326_s18  ;;  %s325_s21 = ssub.s32 %s2754_s30, %s3326_s18 }
  0x12   : > { %p2903_p3 = por %p341_p2, %p340_p1  ;;  %p43_p4 = scmp.ge.s32.totalorder %s3328_s19, 2 }
  0x13   : > { %p346_p5 = scmp.ne.s32.totalorder %s2738_s26, %s2734_s25  ;;  %p347_p6 = scmp.eq.s32.totalorder %s2122_s17, 7 }
  0x14   : > { %p2123_p7 = scmp.ge.s32.totalorder %s2762_s15, 1  ;;  %s3330_s19 = smov (%p43_p4, %s3328_s19), 0 }
  0x15   : > { %3306 = sst [smem:[#allocation27_spill]] %s3330_s19  ;;  %p2912_p8 = por %p347_p6, %p346_p5 }
  0x16   : > { %p354_p9 = scmp.lt.s32.totalorder %s2762_s15, 9  ;;  %s326_s24 = ssub.s32 %s2758_s14, %s3330_s19 }
  0x17   : > { %s3307_s23 = scalar_select %p2912_p8, 1, 0 }
  0x18   : > { %s327_s13 = sor.u32 %s326_s24, %s325_s21  ;;  %p2919_p10 = pnand %p2123_p7, %p354_p9 }
  0x19   : > { %3308 = sst [smem:[#allocation28_spill]] %s3307_s23  ;;  %p328_p11 = scmp.eq.s32.totalorder %s327_s13, 0 }
  0x1a   : > { %p2923_p12 = scmp.eq.s32.totalorder %s2121_s16, 0  ;;  %p2433_p13 = pneg %p2919_p10 }
  0x1b   : > { %s2930_s17 = scalar_select %p328_p11, %s2742_s27, %s330_s20  }
  0x1c   : > { %p2934_p0 = pnand %p2923_p12, %p2433_p13  ;;  %s2764_s21 = smov [#allocation12]  }
  0x1d   : > { %3311 = sst [smem:[#allocation29_spill]] %s2930_s17  ;;  %s388_s24 = sshll.u32 %s2764_s21, 4  ;;  %s389_s24 = int_to_ptr.vmem [resolvable:$true] %s388_s24 }
  0x1e   : > { %p2556_p1 = pneg %p2934_p0  ;;  %s2565_s13 = scalar_lea.vmem %s389_s24, 512 }
  0x1f   : > { %p2566_p2 = scmp.ne.s32.totalorder %s389_s24, %s2565_s13  ;;  %p2573_p6 = scmp.lt.s32.totalorder %s389_s24, %s389_s24 }
  0x20   : > { %p2574_p7 = scmp.lt.s32.totalorder %s2565_s13, %s2565_s13 }
  0x21   : > { %p2568_p4 = pnand %p2566_p2, %p2556_p1 }
  0x22   : > { %p2575_p9 = por %p2574_p7, %p2573_p6 }
  0x23   : > { %p2569_p5 = pneg %p2568_p4 }
  0x25   : > { %p2576_p11 = pnand %p2575_p9, %p2569_p5 }
  0x27   : > { %2579 = shalt.err (!%p2576_p11)
}
  0x28   : > { %s2765_s16 = smov 128   ;;  %s2766_s20 = smov 8  }
  0x29   : > { %2439 = dma.hbm_to_vmem [thread:$0]  (!%p2934_p0), %s3282_s5, 512, %s389_s24, [#allocation13], %s2765_s16, %s2765_s16, %s2766_s20  }
  0x2a   : > { %s2767_s14 = smov [#allocation9]   ;;  %s2768_s27 = smov [#allocation14]  }
  0x2b   : > { %s372_s17 = sshll.u32 %s2767_s14, 4  ;;  %s404_s25 = sshll.u32 %s2768_s27, 4  ;;  %s373_s17 = int_to_ptr.vmem [resolvable:$true] %s372_s17  ;;  %s405_s25 = int_to_ptr.vmem [resolvable:$true] %s404_s25 }
  0x2c   : > { %s2591_s13 = scalar_lea.vmem %s373_s17, 512  ;;  %p2599_p5 = scmp.lt.s32.totalorder %s373_s17, %s373_s17 }
  0x2d   : > { %p2592_p13 = scmp.ne.s32.totalorder %s373_s17, %s2591_s13  ;;  %p2600_p6 = scmp.lt.s32.totalorder %s2591_s13, %s2591_s13 }
  0x2f   : > { %p2594_p2 = pnand %p2592_p13, %p2556_p1  ;;  %p2601_p7 = por %p2600_p6, %p2599_p5 }
  0x31   : > { %p2595_p4 = pneg %p2594_p2 }
  0x33   : > { %p2602_p9 = pnand %p2601_p7, %p2595_p4 }
  0x35   : > { %2605 = shalt.err (!%p2602_p9)
}
  0x36   : > { %2436 = dma.hbm_to_vmem [thread:$0]  (!%p2934_p0), %s3280_s3, 512, %s373_s17, [#allocation10], %s2765_s16, %s2765_s16, %s2766_s20  }
  0x37   : > { %s2617_s19 = scalar_lea.vmem %s405_s25, 512  ;;  %p2625_p8 = scmp.lt.s32.totalorder %s405_s25, %s405_s25 }
  0x38   : > { %p2618_p11 = scmp.ne.s32.totalorder %s405_s25, %s2617_s19  ;;  %p2626_p5 = scmp.lt.s32.totalorder %s2617_s19, %s2617_s19 }
  0x3a   : > { %p2620_p13 = pnand %p2618_p11, %p2556_p1  ;;  %p2627_p4 = por %p2626_p5, %p2625_p8 }
  0x3c   : > { %p2621_p2 = pneg %p2620_p13 }
  0x3e   : > { %p2628_p6 = pnand %p2627_p4, %p2621_p2 }
  0x40   : > { %2631 = shalt.err (!%p2628_p6)
}
  0x41   : > { %2442 = dma.hbm_to_vmem [thread:$0]  (!%p2934_p0), %s3284_s7, 512, %s405_s25, [#allocation13], %s2765_s16, %s2765_s16, %s2766_s20  }
  0x42   : > { %s2769_s17 = smov [#allocation15]  }
  0x43   : > { %s420_s13 = sshll.u32 %s2769_s17, 4  ;;  %s421_s13 = int_to_ptr.vmem [resolvable:$true] %s420_s13 }
  0x44   : > { %s2643_s14 = scalar_lea.vmem %s421_s13, 512  ;;  %p2651_p11 = scmp.lt.s32.totalorder %s421_s13, %s421_s13 }
  0x45   : > { %p2644_p7 = scmp.ne.s32.totalorder %s421_s13, %s2643_s14  ;;  %p2652_p13 = scmp.lt.s32.totalorder %s2643_s14, %s2643_s14 }
  0x47   : > { %p2646_p8 = pnand %p2644_p7, %p2556_p1  ;;  %p2653_p2 = por %p2652_p13, %p2651_p11 }
  0x49   : > { %p2647_p9 = pneg %p2646_p8 }
  0x4b   : > { %p2654_p5 = pnand %p2653_p2, %p2647_p9 }
  0x4d   : > { %2657 = shalt.err (!%p2654_p5)
}
  0x4e   : > { %2445 = dma.hbm_to_vmem [thread:$0]  (!%p2934_p0), %s3286_s9, 512, %s421_s13, [#allocation16], %s2765_s16, %s2765_s16, %s2766_s20  }
  0x4f   : > { %457 = sbr.rel (%p2919_p10) target bundleno = 2018 (0x7e2), region = 72 }
  0x54   : > { %2717 = dma.done.wait (%p2923_p12), [#allocation10], 512  }
  0x55   : > { %2719 = vsyncadd (%p2923_p12), [#allocation10], 4294966784 }
  0x56   : > { %2721 = dma.done.wait (%p2923_p12), [#allocation13], 1024  }
  0x57   : > { %2723 = vsyncadd (%p2923_p12), [#allocation13], 4294966272 }
  0x58   : > { %2725 = dma.done.wait (%p2923_p12), [#allocation16], 512  }
  0x59   : > { %2727 = vsyncadd (%p2923_p12), [#allocation16], 4294966784  ;;  %s514_s18 = sand.u32 1, %s2738_s26   ;;  %p517_p10 = scmp.lt.s32.totalorder %s2746_s28, 3 }
  0x5a   : > { %s2134_s23 = sshll.u32 %s514_s18, 4  ;;  %p519_p0 = scmp.lt.s32.totalorder %s2750_s29, 1 }
  0x5b   : > { %s518_s16 = scalar_select %p517_p10, %s2746_s28, 3 }
  0x5c   : > { %s520_s20 = scalar_select %p519_p0, %s2750_s29, 1 }
  0x5d   : > { %s2136_s19 = sshll.u32 %s518_s16, 2  ;;  %s3010_s25 = scalar_lea.vmem [#allocation17], %s2134_s23 }
  0x5e   : > { %s2135_s24 = sshll.u32 %s520_s20, 1  ;;  %p2138_p12 = scmp.ne.s32.totalorder %s2746_s28, 0 }
  0x5f   : > { %s523_s21 = sadd.s32 %s2136_s19, %s2135_s24 }
  0x60   : > { %s2137_s17 = sshll.u32 %s523_s21, 3  ;;  %529 = sbr.rel (%p2138_p12) target bundleno = 109 (0x6d), region = 92 }
  0x61   : > { %s3008_s14 = scalar_lea.vmem %s3277_s0, %s2137_s17 }
  0x65   : > { %vm530_vm0 = vcmask 261120   ;;  %v2770_v0 = vmov 0.0  }
  0x66   : > { %531 = vst.msk [vmem:[#allocation2] sm:$0xff] %vm530_vm0, %v2770_v0  ;;  %532 = vst.msk [vmem:[#allocation2 + $0x8] sm:$0xff] %vm530_vm0, %v2770_v0 }
  0x67   : > { %533 = vst.msk [vmem:[#allocation3] sm:$0xff] %vm530_vm0, %v2770_v0  ;;  %534 = vst.msk [vmem:[#allocation3 + $0x8] sm:$0xff] %vm530_vm0, %v2770_v0 }
  0x68   : > { %535 = vst.msk [vmem:[#allocation4] sm:$0xff] %vm530_vm0, %v2770_v0  ;;  %536 = vst.msk [vmem:[#allocation4 + $0x8] sm:$0xff] %vm530_vm0, %v2770_v0 }
  0x69   : > { %537 = vst.msk [vmem:[#allocation5] sm:$0xff] %vm530_vm0, %v2770_v0  ;;  %538 = vst.msk [vmem:[#allocation5 + $0x8] sm:$0xff] %vm530_vm0, %v2770_v0 }
  0x6a   : > { %539 = vst.msk [vmem:[#allocation6] sm:$0xff] %vm530_vm0, %v2770_v0  ;;  %540 = vst.msk [vmem:[#allocation6 + $0x8] sm:$0xff] %vm530_vm0, %v2770_v0 }
  0x6b   : > { %541 = vst [vmem:[#allocation7] sm:$0xff] %v2770_v0  ;;  %542 = vst [vmem:[#allocation7 + $0x8] sm:$0xff] %v2770_v0 }
  0x6c   : > { %543 = vst.msk [vmem:[#allocation8] sm:$0xff] %vm530_vm0, %v2770_v0  ;;  %544 = vst.msk [vmem:[#allocation8 + $0x8] sm:$0xff] %vm530_vm0, %v2770_v0 }
  0x6d PF: > { %v550_v1 = vld [vmem:[%s3278_s1 + $0x18] sm:$0xff]  ;;  %v549_v2 = vld [vmem:[%s3278_s1 + $0x10] sm:$0xff]  ;;  %vm558_vm1 = vcmask 261120   ;;  %v3020_v3 = vld [vmem:[%s3008_s14] sm:$0xff]  ;;  %v2771_v32 = vmov 0.0   ;;  %vm866_vm3 = vcmask 64512  }
  0x6e   : > { %2269 = vmatprep.subr.mxu1 %v550_v1  ;;  %v548_v4 = vld [vmem:[%s3278_s1 + $0x8] sm:$0xff]  ;;  %2277 = vmatprep.mubr.msk.f32.mxu1 %vm558_vm1, %v3020_v3  ;;  %v547_v5 = vld [vmem:[%s3278_s1] sm:$0xff]  ;;  %v659_v9 = vld [vmem:[#allocation9 + $0x8] sm:$0xff]  ;;  %s2772_s20 = smov 120   ;;  %s2773_s19 = smov 112   ;;  %vm956_vm9 = vcmask 130048  }
  0x6f   : > { %2270 = vmatpush3.msra.mxu1 %v550_v1  ;;  %v3031_v6 = vld [vmem:[%s3008_s14 + $0x8] sm:$0xff]  ;;  %v660_v8 = vld [vmem:[#allocation9 + $0x10] sm:$0xff]  ;;  %v658_v10 = vld [vmem:[#allocation9] sm:$0xff]  ;;  %s2775_s24 = smov 104   ;;  %s2776_s21 = smov 8   ;;  %vm1616_vm10 = vcmask 195584  }
  0x70   : > { %2271 = vmatprep.subr.mxu1 %v549_v2  ;;  %v661_v7 = vld [vmem:[#allocation9 + $0x18] sm:$0xff]  ;;  %v764_v12 = vld [vmem:[#allocation12 + $0x10] sm:$0xff]  ;;  %v763_v13 = vld [vmem:[#allocation12 + $0x8] sm:$0xff]  ;;  %s2777_s17 = smov 16   ;;  %s2778_s13 = smov 24  }
  0x71   : > { %2272 = vmatpush3.msra.mxu1 %v549_v2  ;;  %v765_v11 = vld [vmem:[#allocation12 + $0x18] sm:$0xff]  ;;  %v762_v14 = vld [vmem:[#allocation12] sm:$0xff]  ;;  %v2139_v15 = vld [vmem:[%s3279_s2] ss:$0 sm:$0xff]  ;;  %s1995_s27 = sshll.u32 %s3010_s25, 4  ;;  %s3313_s23 = sld [smem:[#allocation30_spill]]  ;;  %s3217_s27 = int_to_ptr.vmem [resolvable:$true] %s1995_s27 }
  0x72   : > { %2273 = vmatprep.subr.mxu1 %v548_v4  ;;  %v641_v17 = vld [vmem:[#allocation2 + $0x8] sm:$0xff]  ;;  %v640_v20 = vld [vmem:[#allocation2] sm:$0xff]  ;;  %v745_v29 = vld [vmem:[#allocation3 + $0x8] sm:$0xff] }
  0x73   : > { %2274 = vmatpush3.msra.mxu1 %v548_v4  ;;  %v2142_v25 = vld [vmem:[%s3281_s4] ss:$0 sm:$0xff]  ;;  %v744_v35 = vld [vmem:[#allocation3] sm:$0xff]  ;;  %v849_v50 = vld [vmem:[#allocation4 + $0x8] sm:$0xff] }
  0x74   : > { %2275 = vmatprep.subr.mxu1 %v547_v5  ;;  %v2145_v45 = vld [vmem:[%s3283_s6] ss:$0 sm:$0xff] }
  0x75   : > { %2276 = vmatpush3.msra.mxu1 %v547_v5  ;;  %v848_v55 = vld [vmem:[#allocation4] sm:$0xff] }
  0x76   : > { %2278 = vmatmul.mubr.msk.f32.vlgmr.msra.gmra.mxu1 %vm558_vm1, %v3031_v6  ;;  %2280 = vmatprep.subr.mxu1 %v661_v7 }
  0x77   : > { %2281 = vmatpush3.msra.mxu1 %v661_v7  ;;  %2288 = vmatprep.mubr.msk.f32.mxu1 %vm558_vm1, %v3020_v3 }
  0x78   : > { %2282 = vmatprep.subr.mxu1 %v660_v8 }
  0x79   : > { %2283 = vmatpush3.msra.mxu1 %v660_v8 }
  0x7a   : > { %2284 = vmatprep.subr.mxu1 %v659_v9 }
  0x7b   : > { %2285 = vmatpush3.msra.mxu1 %v659_v9 }
  0x7c   : > { %2286 = vmatprep.subr.mxu1 %v658_v10 }
  0x7d   : > { %2287 = vmatpush3.msra.mxu1 %v658_v10 }
  0x7e   : > { %2289 = vmatmul.mubr.msk.f32.vlgmr.msra.gmra.mxu1 %vm558_vm1, %v3031_v6  ;;  %2291 = vmatprep.subr.mxu1 %v765_v11 }
  0x7f   : > { %2292 = vmatpush3.msra.mxu1 %v765_v11  ;;  %2299 = vmatprep.mubr.msk.f32.mxu1 %vm558_vm1, %v3020_v3 }
  0x80   : > { %2293 = vmatprep.subr.mxu1 %v764_v12 }
  0x81   : > { %2294 = vmatpush3.msra.mxu1 %v764_v12  ;;  %v2774_v12 = vmov 1.0  }
  0x82   : > { %2295 = vmatprep.subr.mxu1 %v763_v13 }
  0x83   : > { %2296 = vmatpush3.msra.mxu1 %v763_v13 }
  0x84   : > { %2297 = vmatprep.subr.mxu1 %v762_v14 }
  0x85   : > { %2298 = vmatpush3.msra.mxu1 %v762_v14 }
  0x86   : > { %2300 = vmatmul.mubr.msk.f32.vlgmr.msra.gmra.mxu1 %vm558_vm1, %v3031_v6 }
 0x136   : > { %v2279_v16 = vpop.f32.mrf.mxu1 }
 0x137   : > { %v637_v18 = vadd.f32 %v2279_v16, %v2139_v15 }
 0x138   : > { %v631_v19 = vpop.f32.mrf.mxu1 }
 0x139   : > { %v643_v21 = vsub.f32 %v637_v18, %v641_v17  ;;  %v632_v22 = vadd.f32 %v2139_v15, %v631_v19 }
 0x13b   : > { %v645_v23 = vmul.f32 0.5, %v643_v21  ;;  %v642_v24 = vsub.f32 %v632_v22, %v640_v20 }
 0x13d   : > { %v647_v26 = vadd.f32 %v645_v23, %v641_v17  ;;  %v644_v27 = vmul.f32 0.5, %v642_v24 }
 0x13e   : > { %v2290_v28 = vpop.f32.mrf.mxu1 }
 0x13f   : > { %vm649_vm2 = vcmp.ge.f32.partialorder %v647_v26, 0.5  ;;  %v646_v30 = vadd.f32 %v644_v27, %v640_v20  ;;  %v741_v31 = vadd.f32 %v2290_v28, %v2142_v25 }
 0x140   : > { %v651_v33 = vsel %vm649_vm2, 1.0, %v2771_v32  ;;  %v735_v34 = vpop.f32.mrf.mxu1 }
 0x141   : > { %v653_v36 = vsub.f32 1.0, %v651_v33  ;;  %v747_v37 = vsub.f32 %v741_v31, %v745_v29  ;;  %v736_v38 = vadd.f32 %v2142_v25, %v735_v34  ;;  %vm648_vm4 = vcmp.ge.f32.partialorder %v646_v30, 0.5 }
 0x142   : > { %v650_v39 = vsel %vm648_vm4, 1.0, %v2771_v32 }
 0x143   : > { %v655_v40 = vmul.f32 %v653_v36, %v647_v26  ;;  %v749_v41 = vmul.f32 0.5, %v747_v37  ;;  %v746_v42 = vsub.f32 %v736_v38, %v744_v35  ;;  %v652_v43 = vsub.f32 1.0, %v650_v39  ;;  %2306 = vmatprep.mubr.msk.f32.mxu1 %vm866_vm3, %v650_v39 }
 0x144   : > { %v3052_v44 = vpack.i.bf16 %v651_v33, %v650_v39 }
 0x145   : > { %657 = vst.msk [vmem:[#allocation2 + $0x8] sm:$0xff] %vm558_vm1, %v655_v40  ;;  %v751_v46 = vadd.f32 %v749_v41, %v745_v29  ;;  %v748_v47 = vmul.f32 0.5, %v746_v42  ;;  %v654_v48 = vmul.f32 %v652_v43, %v646_v30 }
 0x146   : > { %2540 = vrot.lane.b32.xlu1 %v3052_v44, %s2772_s20  ;;  %v2301_v49 = vpop.f32.mrf.mxu1 }
 0x147   : > { %vm753_vm5 = vcmp.ge.f32.partialorder %v751_v46, 0.5  ;;  %v750_v51 = vadd.f32 %v748_v47, %v744_v35  ;;  %656 = vst.msk [vmem:[#allocation2] sm:$0xff] %vm558_vm1, %v654_v48  ;;  %v845_v52 = vadd.f32 %v2301_v49, %v2145_v45 }
 0x148   : > { %v755_v53 = vsel %vm753_vm5, 1.0, %v2771_v32  ;;  %v839_v54 = vpop.f32.mrf.mxu1 }
 0x149   : > { %v757_v56 = vsub.f32 1.0, %v755_v53  ;;  %vm752_vm6 = vcmp.ge.f32.partialorder %v750_v51, 0.5  ;;  %v851_v57 = vsub.f32 %v845_v52, %v849_v50  ;;  %v840_v58 = vadd.f32 %v2145_v45, %v839_v54  ;;  %1046 = vrot.lane.b32.xlu0 %v755_v53, %s2772_s20  ;;  %2302 = vmatprep.subr.msk.mxu1 %vm866_vm3, %v755_v53 }
 0x14a   : > { %v754_v59 = vsel %vm752_vm6, 1.0, %v2771_v32  ;;  %2303 = vmatpush3.xpose.msk.msra.mxu1 %vm866_vm3, %v755_v53 }
 0x14b   : > { %v759_v60 = vmul.f32 %v757_v56, %v751_v46  ;;  %v756_v61 = vsub.f32 1.0, %v754_v59  ;;  %v853_v62 = vmul.f32 0.5, %v851_v57  ;;  %v850_v63 = vsub.f32 %v840_v58, %v848_v55  ;;  %2304 = vmatprep.subr.msk.mxu1 %vm866_vm3, %v754_v59 }
 0x14d   : > { %761 = vst.msk [vmem:[#allocation3 + $0x8] sm:$0xff] %vm558_vm1, %v759_v60  ;;  %v758_v0 = vmul.f32 %v756_v61, %v750_v51  ;;  %v855_v1 = vadd.f32 %v853_v62, %v849_v50  ;;  %v852_v2 = vmul.f32 0.5, %v850_v63  ;;  %1044 = vrot.lane.b32.xlu0 %v754_v59, %s2772_s20  ;;  %v1640_v61 = vld [vmem:[#allocation14 + $0x18] sm:$0xff]  ;;  %v1639_v62 = vld [vmem:[#allocation14 + $0x10] sm:$0xff]  ;;  %v1638_v63 = vld [vmem:[#allocation14 + $0x8] sm:$0xff] }
 0x14e   : > { %2305 = vmatpush3.xpose.msk.msra.mxu1 %vm866_vm3, %v754_v59 }
 0x14f   : > { %760 = vst.msk [vmem:[#allocation3] sm:$0xff] %vm558_vm1, %v758_v0  ;;  %v854_v4 = vadd.f32 %v852_v2, %v848_v55  ;;  %vm857_vm7 = vcmp.ge.f32.partialorder %v855_v1, 0.5  ;;  %v1637_v0 = vld [vmem:[#allocation14] sm:$0xff] }
 0x150   : > { %v859_v5 = vsel %vm857_vm7, 1.0, %v2771_v32  ;;  %2309 = vmatprep.subr.msk.mxu0 %vm857_vm7, %v2774_v12 }
 0x151   : > { %v861_v7 = vsub.f32 1.0, %v859_v5  ;;  %1137 = vrot.lane.b32.xlu1 %v859_v5, %s2772_s20  ;;  %2307 = vmatmul.mubr.msk.f32.vlgmr.msra.gmra.mxu1 %vm866_vm3, %v651_v33  ;;  %vm856_vm8 = vcmp.ge.f32.partialorder %v854_v4, 0.5 }
 0x152   : > { %v858_v8 = vsel %vm856_vm8, 1.0, %v2771_v32  ;;  %2310 = vmatpush3.msk.msra.mxu0 %vm857_vm7, %v2774_v12 }
 0x153   : > { %v863_v9 = vmul.f32 %v861_v7, %v855_v1  ;;  %v860_v10 = vsub.f32 1.0, %v858_v8  ;;  %1135 = vrot.lane.b32.xlu0 %v858_v8, %s2772_s20  ;;  %2311 = vmatprep.subr.msk.mxu0 %vm856_vm8, %v2774_v12  ;;  %s3224_s20 = scalar_lea.sflag [#allocation11], %s514_s18 }
 0x154   : > { %2312 = vmatpush3.msk.msra.mxu0 %vm856_vm8, %v2774_v12 }
 0x155   : > { %865 = vst.msk [vmem:[#allocation4 + $0x8] sm:$0xff] %vm558_vm1, %v863_v9  ;;  %v862_v11 = vmul.f32 %v860_v10, %v854_v4  ;;  %1230 = vrot.lane.b32.xlu1 %v755_v53, %s2773_s19 }
 0x157   : > { %864 = vst.msk [vmem:[#allocation4] sm:$0xff] %vm558_vm1, %v862_v11  ;;  %1228 = vrot.lane.b32.xlu0 %v754_v59, %s2773_s19 }
 0x159   : > { %2545 = vrot.lane.b32.xlu1 %v3052_v44, %s2773_s19 }
 0x15b   : > { %1319 = vrot.lane.b32.xlu0 %v859_v5, %s2773_s19 }
 0x15d   : > { %1317 = vrot.lane.b32.xlu1 %v858_v8, %s2773_s19  ;;  %s2658_s19 = scalar_lea.vmem %s3217_s27, 256 }
 0x15e   : > { %p2659_p1 = scmp.ne.s32.totalorder %s3217_s27, %s2658_s19 }
 0x15f   : > { %1412 = vrot.lane.b32.xlu0 %v755_v53, %s2775_s24 }
 0x160   : > { %p2660_p4 = pnand %p2659_p1, %p2903_p3 }
 0x161   : > { %1410 = vrot.lane.b32.xlu1 %v754_v59, %s2775_s24 }
 0x162   : > { %p2661_p6 = pneg %p2660_p4 }
 0x163   : > { %2550 = vrot.lane.b32.xlu0 %v3052_v44, %s2775_s24 }
 0x165   : > { %1501 = vrot.lane.b32.xlu1 %v859_v5, %s2775_s24 }
 0x167   : > { %1499 = vrot.lane.b32.xlu0 %v858_v8, %s2775_s24  ;;  %s2779_s24 = smov [#allocation17]  }
 0x1b8   : > { %v2541_v13 = vpop.permute.xlu1 %2540 }
 0x1b9   : > { %v2542_v14 = vunpack.i.l.bf16 %v2541_v13  ;;  %v2543_v17 = vunpack.i.h.bf16 %v2541_v13 }
 0x1bb   : > { %2320 = vmatprep.mubr.msk.f32.mxu1 %vm866_vm3, %v2542_v14  ;;  %v1047_v15 = vpop.permute.xlu0 %1046 }
 0x1bc   : > { %2316 = vmatprep.subr.msk.mxu1 %vm866_vm3, %v1047_v15 }
 0x1bd   : > { %2317 = vmatpush3.xpose.msk.msra.mxu1 %vm866_vm3, %v1047_v15  ;;  %v1620_v15 = vld [vmem:[#allocation5 + $0x8] sm:$0xff] }
 0x1bf   : > { %v1045_v16 = vpop.permute.xlu0 %1044 }
 0x1c0   : > { %2318 = vmatprep.subr.msk.mxu1 %vm866_vm3, %v1045_v16 }
 0x1c1   : > { %2319 = vmatpush3.xpose.msk.msra.mxu1 %vm866_vm3, %v1045_v16 }
 0x1c3   : > { %v1138_v18 = vpop.permute.xlu1 %1137 }
 0x1c4   : > { %2321 = vmatmul.mubr.msk.f32.vlgmr.msra.gmra.mxu1 %vm866_vm3, %v2543_v17  ;;  %2323 = vmatprep.subr.mxu0 %v1138_v18 }
 0x1c5   : > { %v1136_v19 = vpop.permute.xlu0 %1135 }
 0x1c7   : > { %v1231_v20 = vpop.permute.xlu1 %1230 }
 0x1c9   : > { %v1229_v21 = vpop.permute.xlu0 %1228 }
 0x1cb   : > { %v2546_v22 = vpop.permute.xlu1 %2545 }
 0x1cc   : > { %v2547_v35 = vunpack.i.l.bf16 %v2546_v22  ;;  %v2548_v39 = vunpack.i.h.bf16 %v2546_v22 }
 0x1cd   : > { %v1320_v23 = vpop.permute.xlu0 %1319 }
 0x1ce   : > { %2337 = vmatprep.subr.mxu1 %v1320_v23 }
 0x1cf   : > { %v1318_v24 = vpop.permute.xlu1 %1317  ;;  %2338 = vmatpush3.msra.mxu1 %v1320_v23 }
 0x1d0   : > { %2339 = vmatprep.subr.mxu1 %v1318_v24 }
 0x1d1   : > { %v1413_v25 = vpop.permute.xlu0 %1412  ;;  %2340 = vmatpush3.msra.mxu1 %v1318_v24 }
 0x1d2   : > { %2344 = vmatprep.subr.msk.mxu1 %vm866_vm3, %v1413_v25 }
 0x1d3   : > { %v1411_v36 = vpop.permute.xlu1 %1410 }
 0x1d5   : > { %v2551_v37 = vpop.permute.xlu0 %2550 }
 0x1d6   : > { %v2552_v51 = vunpack.i.l.bf16 %v2551_v37  ;;  %v2553_v52 = vunpack.i.h.bf16 %v2551_v37  ;;  %v1752_v37 = vld [vmem:[#allocation15 + $0x18] sm:$0xff] }
 0x1d7   : > { %v1502_v38 = vpop.permute.xlu1 %1501 }
 0x1d9   : > { %v1500_v40 = vpop.permute.xlu0 %1499 }
 0x211   : > { %v2308_v26 = vpop.f32.mrf.mxu1 }
 0x212   : > { %v955_v29 = vmul.f32 0.25, %v2308_v26 }
 0x213   : > { %v945_v27 = vpop.f32.mrf.mxu1 }
 0x214   : > { %v954_v28 = vmul.f32 0.25, %v945_v27 }
 0x216   : > { %2313 = vmatprep.mubr.msk.f32.mxu0 %vm956_vm9, %v954_v28 }
 0x217   : > { %2314 = vmatmul.mubr.msk.f32.vlgmr.msra.gmra.mxu0 %vm956_vm9, %v955_v29 }
 0x218   : > { %2324 = vmatpush3.msra.mxu0 %v1138_v18 }
 0x219   : > { %2325 = vmatprep.subr.mxu0 %v1136_v19 }
 0x21a   : > { %2326 = vmatpush3.msra.mxu0 %v1136_v19 }
 0x21b   : > { %2330 = vmatprep.subr.msk.mxu0 %vm866_vm3, %v1231_v20 }
 0x284   : > { %v2322_v30 = vpop.f32.mrf.mxu1 }
 0x285   : > { %v1132_v34 = vmul.f32 0.25, %v2322_v30 }
 0x286   : > { %v1122_v31 = vpop.f32.mrf.mxu1 }
 0x287   : > { %v1131_v33 = vmul.f32 0.25, %v1122_v31 }
 0x289   : > { %2327 = vmatprep.mubr.msk.f32.mxu0 %vm956_vm9, %v1131_v33 }
 0x28a   : > { %2328 = vmatmul.mubr.msk.f32.vlgmr.msra.gmra.mxu0 %vm956_vm9, %v1132_v34 }
 0x28b   : > { %2331 = vmatpush3.xpose.msk.msra.mxu0 %vm866_vm3, %v1231_v20  ;;  %2334 = vmatprep.mubr.msk.f32.mxu0 %vm866_vm3, %v2547_v35  ;;  %v1619_v20 = vld [vmem:[#allocation5] sm:$0xff] }
 0x28c   : > { %2332 = vmatprep.subr.msk.mxu0 %vm866_vm3, %v1229_v21 }
 0x28f   : > { %2333 = vmatpush3.xpose.msk.msra.mxu0 %vm866_vm3, %v1229_v21 }
 0x290   : > { %2351 = vmatprep.subr.mxu0 %v1502_v38 }
 0x292   : > { %2335 = vmatmul.mubr.msk.f32.vlgmr.msra.gmra.mxu0 %vm866_vm3, %v2548_v39  ;;  %v1750_v39 = vld [vmem:[#allocation15 + $0x8] sm:$0xff] }
 0x293   : > { %2352 = vmatpush3.msra.mxu0 %v1502_v38  ;;  %v1751_v38 = vld [vmem:[#allocation15 + $0x10] sm:$0xff] }
 0x294   : > { %2353 = vmatprep.subr.mxu0 %v1500_v40 }
 0x295   : > { %2354 = vmatpush3.msra.mxu0 %v1500_v40  ;;  %v1749_v40 = vld [vmem:[#allocation15] sm:$0xff] }
 0x296   : > { %2358 = vmatprep.subr.mxu0 %v1640_v61 }
 0x2d7   : > { %v2315_v41 = vpop.f32.mrf.mxu0 }
 0x2d8   : > { %v1039_v10 = vmul.f32 0.25, %v2315_v41  ;;  %v1874_v41 = vld [vmem:[%s3288_s11 + $0x78] sm:$0xff] }
 0x2d9   : > { %v1029_v42 = vpop.f32.mrf.mxu0 }
 0x2da   : > { %v1038_v13 = vmul.f32 0.25, %v1029_v42  ;;  %v1873_v42 = vld [vmem:[%s3288_s11 + $0x70] sm:$0xff] }
 0x34a   : > { %v2329_v43 = vpop.f32.mrf.mxu0 }
 0x34b   : > { %v1223_v44 = vmul.f32 0.25, %v2329_v43  ;;  %v1872_v43 = vld [vmem:[%s3288_s11 + $0x68] sm:$0xff] }
 0x34c   : > { %v1213_v45 = vpop.f32.mrf.mxu0 }
 0x34d   : > { %v1222_v46 = vmul.f32 0.25, %v1213_v45  ;;  %1592 = vrot.lane.b32.xlu0 %v1223_v44, %s2776_s21  ;;  %v1871_v44 = vld [vmem:[%s3288_s11 + $0x60] sm:$0xff]  ;;  %v1870_v45 = vld [vmem:[%s3288_s11 + $0x58] sm:$0xff] }
 0x34f   : > { %1590 = vrot.lane.b32.xlu1 %v1222_v46, %s2776_s21  ;;  %v1869_v46 = vld [vmem:[%s3288_s11 + $0x50] sm:$0xff] }
 0x352   : > { %v2336_v47 = vpop.f32.mrf.mxu0 }
 0x353   : > { %v1316_v50 = vmul.f32 0.25, %v2336_v47  ;;  %v1868_v47 = vld [vmem:[%s3288_s11 + $0x48] sm:$0xff] }
 0x354   : > { %v1306_v48 = vpop.f32.mrf.mxu0 }
 0x355   : > { %v1315_v49 = vmul.f32 0.25, %v1306_v48  ;;  %v1867_v48 = vld [vmem:[%s3288_s11 + $0x40] sm:$0xff] }
 0x357   : > { %2341 = vmatprep.mubr.msk.f32.mxu1 %vm956_vm9, %v1315_v49  ;;  %v1866_v49 = vld [vmem:[%s3288_s11 + $0x38] sm:$0xff] }
 0x358   : > { %2342 = vmatmul.mubr.msk.f32.vlgmr.msra.gmra.mxu1 %vm956_vm9, %v1316_v50  ;;  %v1865_v50 = vld [vmem:[%s3288_s11 + $0x30] sm:$0xff] }
 0x359   : > { %2345 = vmatpush3.xpose.msk.msra.mxu1 %vm866_vm3, %v1413_v25  ;;  %2348 = vmatprep.mubr.msk.f32.mxu1 %vm866_vm3, %v2552_v51  ;;  %v2174_v51 = vld [vmem:[%s3285_s8] ss:$0 sm:$0xff] }
 0x35a   : > { %2346 = vmatprep.subr.msk.mxu1 %vm866_vm3, %v1411_v36 }
 0x35d   : > { %2347 = vmatpush3.xpose.msk.msra.mxu1 %vm866_vm3, %v1411_v36 }
 0x35e   : > { %2369 = vmatprep.subr.mxu1 %v1752_v37 }
 0x360   : > { %2349 = vmatmul.mubr.msk.f32.vlgmr.msra.gmra.mxu1 %vm866_vm3, %v2553_v52 }
 0x361   : > { %2370 = vmatpush3.msra.mxu1 %v1752_v37  ;;  %v1958_v37 = vld [vmem:[#allocation8 + $0x8] sm:$0xff] }
 0x362   : > { %2371 = vmatprep.subr.mxu1 %v1751_v38 }
 0x363   : > { %2372 = vmatpush3.msra.mxu1 %v1751_v38 }
 0x364   : > { %2373 = vmatprep.subr.mxu1 %v1750_v39 }
 0x365   : > { %2374 = vmatpush3.msra.mxu1 %v1750_v39 }
 0x366   : > { %2375 = vmatprep.subr.mxu1 %v1749_v40 }
 0x367   : > { %2376 = vmatpush3.msra.mxu1 %v1749_v40  ;;  %v1957_v40 = vld [vmem:[#allocation8] sm:$0xff] }
 0x3bf   : > { %v1593_v7 = vpop.permute.xlu0 %1592 }
 0x3c0   : > { %v1613_v14 = vsel %vm866_vm3, %v1039_v10, %v1593_v7  ;;  %v1864_v10 = vld [vmem:[%s3288_s11 + $0x28] sm:$0xff] }
 0x3c1   : > { %v1591_v8 = vpop.permute.xlu1 %1590 }
 0x3c2   : > { %v1612_v18 = vsel %vm866_vm3, %v1038_v13, %v1591_v8  ;;  %v1860_v13 = vld [vmem:[%s3288_s11 + $0x8] sm:$0xff] }
 0x418   : > { %v2343_v53 = vpop.f32.mrf.mxu1 }
 0x419   : > { %v1405_v54 = vmul.f32 0.25, %v2343_v53  ;;  %v1730_v53 = vld [vmem:[#allocation6 + $0x8] sm:$0xff] }
 0x41a   : > { %v1395_v55 = vpop.f32.mrf.mxu1 }
 0x41b   : > { %v1404_v56 = vmul.f32 0.25, %v1395_v55  ;;  %1600 = vrot.lane.b32.xlu0 %v1405_v54, %s2777_s17 }
 0x41d   : > { %1598 = vrot.lane.b32.xlu1 %v1404_v56, %s2777_s17  ;;  %v1729_v56 = vld [vmem:[#allocation6] sm:$0xff]  ;;  %s2184_s17 = sshll.u32 %s2750_s29, 1 }
 0x420   : > { %v2350_v57 = vpop.f32.mrf.mxu1 }
 0x421   : > { %v1498_v60 = vmul.f32 0.25, %v2350_v57 }
 0x422   : > { %v1488_v58 = vpop.f32.mrf.mxu1 }
 0x423   : > { %v1497_v59 = vmul.f32 0.25, %v1488_v58 }
 0x425   : > { %2355 = vmatprep.mubr.msk.f32.mxu0 %vm956_vm9, %v1497_v59 }
 0x426   : > { %2356 = vmatmul.mubr.msk.f32.vlgmr.msra.gmra.mxu0 %vm956_vm9, %v1498_v60 }
 0x427   : > { %2359 = vmatpush3.msra.mxu0 %v1640_v61 }
 0x428   : > { %2360 = vmatprep.subr.mxu0 %v1639_v62 }
 0x429   : > { %2361 = vmatpush3.msra.mxu0 %v1639_v62 }
 0x42a   : > { %2362 = vmatprep.subr.mxu0 %v1638_v63 }
 0x42b   : > { %2363 = vmatpush3.msra.mxu0 %v1638_v63 }
 0x42c   : > { %2364 = vmatprep.subr.mxu0 %v1637_v0 }
 0x42d   : > { %2365 = vmatpush3.msra.mxu0 %v1637_v0 }
 0x42e   : > { %2380 = vmatprep.subr.mxu0 %v1874_v41 }
 0x48d   : > { %v1601_v9 = vpop.permute.xlu0 %1600 }
 0x48e   : > { %v1615_v16 = vsel %vm956_vm9, %v1613_v14, %v1601_v9  ;;  %v1859_v14 = vld [vmem:[%s3288_s11] sm:$0xff] }
 0x48f   : > { %v1599_v11 = vpop.permute.xlu1 %1598 }
 0x490   : > { %v1614_v21 = vsel %vm956_vm9, %v1612_v18, %v1599_v11  ;;  %v1861_v11 = vld [vmem:[%s3288_s11 + $0x10] sm:$0xff] }
 0x4e6   : > { %v2357_v1 = vpop.f32.mrf.mxu0 }
 0x4e7   : > { %v1587_v2 = vmul.f32 0.25, %v2357_v1 }
 0x4e8   : > { %v1577_v4 = vpop.f32.mrf.mxu0 }
 0x4e9   : > { %v1586_v5 = vmul.f32 0.25, %v1577_v4  ;;  %1608 = vrot.lane.b32.xlu0 %v1587_v2, %s2778_s13 }
 0x4eb   : > { %1606 = vrot.lane.b32.xlu1 %v1586_v5, %s2778_s13  ;;  %s2185_s13 = sshll.u32 %s2746_s28, 2 }
 0x4ec   : > { %s1992_s30 = sadd.s32 %s2185_s13, %s2184_s17  ;;  %s2662_s17 = sshll.u32 %s2779_s24, 4  ;;  %s2663_s17 = int_to_ptr.vmem [resolvable:$false] %s2662_s17 }
 0x4ed   : > { %s2186_s14 = sshll.u32 %s1992_s30, 7  ;;  %s2664_s13 = scalar_lea.vmem %s2663_s17, 512 }
 0x4ee   : > { %s3212_s16 = scalar_lea.hbm %s3313_s23, %s2186_s14  ;;  %p2665_p7 = scmp.lt.s32.totalorder %s3217_s27, %s2663_s17 }
 0x4ef   : > { %p2666_p8 = scmp.lt.s32.totalorder %s2664_s13, %s2658_s19 }
 0x4f1   : > { %p2667_p9 = por %p2666_p8, %p2665_p7 }
 0x4f3   : > { %p2668_p11 = pnand %p2667_p9, %p2661_p6 }
 0x55b   : > { %v1609_v17 = vpop.permute.xlu0 %1608 }
 0x55c   : > { %v1618_v19 = vsel %vm1616_vm10, %v1615_v16, %v1609_v17  ;;  %v1842_v17 = vld [vmem:[#allocation7 + $0x8] sm:$0xff] }
 0x55d   : > { %v1622_v22 = vsub.f32 %v1618_v19, %v1620_v15  ;;  %v1607_v23 = vpop.permute.xlu1 %1606 }
 0x55e   : > { %v1617_v24 = vsel %vm1616_vm10, %v1614_v21, %v1607_v23 }
 0x55f   : > { %v1624_v25 = vmul.f32 0.5, %v1622_v22  ;;  %v1621_v26 = vsub.f32 %v1617_v24, %v1619_v20 }
 0x561   : > { %v1626_v27 = vadd.f32 %v1624_v25, %v1620_v15  ;;  %v1623_v28 = vmul.f32 0.5, %v1621_v26  ;;  %v2177_v15 = vld [vmem:[%s3287_s10] ss:$0 sm:$0xff] }
 0x563   : > { %v1625_v29 = vadd.f32 %v1623_v28, %v1619_v20  ;;  %vm1628_vm11 = vcmp.ge.f32.partialorder %v1626_v27, 0.5  ;;  %v1841_v20 = vld [vmem:[#allocation7] sm:$0xff] }
 0x564   : > { %v1630_v30 = vsel %vm1628_vm11, 1.0, %v2771_v32 }
 0x565   : > { %vm1627_vm12 = vcmp.ge.f32.partialorder %v1625_v29, 0.5  ;;  %v1632_v31 = vsub.f32 1.0, %v1630_v30 }
 0x566   : > { %v1629_v33 = vsel %vm1627_vm12, 1.0, %v2771_v32 }
 0x567   : > { %v1631_v34 = vsub.f32 1.0, %v1629_v33  ;;  %2366 = vmatprep.mubr.msk.f32.mxu0 %vm558_vm1, %v1629_v33  ;;  %v1634_v35 = vmul.f32 %v1632_v31, %v1626_v27 }
 0x568   : > { %2367 = vmatmul.mubr.msk.f32.vlgmr.msra.gmra.mxu0 %vm558_vm1, %v1630_v30 }
 0x569   : > { %v1633_v36 = vmul.f32 %v1631_v34, %v1625_v29  ;;  %1636 = vst.msk [vmem:[#allocation5 + $0x8] sm:$0xff] %vm558_vm1, %v1634_v35  ;;  %2381 = vmatpush3.msra.mxu0 %v1874_v41  ;;  %v2180_v35 = vld [vmem:[%s3289_s12] ss:$0 sm:$0xff] }
 0x56a   : > { %2382 = vmatprep.subr.mxu0 %v1873_v42 }
 0x56b   : > { %1635 = vst.msk [vmem:[#allocation5] sm:$0xff] %vm558_vm1, %v1633_v36  ;;  %2383 = vmatpush3.msra.mxu0 %v1873_v42 }
 0x56c   : > { %2384 = vmatprep.subr.mxu0 %v1872_v43 }
 0x56d   : > { %2385 = vmatpush3.msra.mxu0 %v1872_v43 }
 0x56e   : > { %2386 = vmatprep.subr.mxu0 %v1871_v44 }
 0x56f   : > { %2387 = vmatpush3.msra.mxu0 %v1871_v44 }
 0x570   : > { %2388 = vmatprep.subr.mxu0 %v1870_v45 }
 0x571   : > { %2389 = vmatpush3.msra.mxu0 %v1870_v45 }
 0x572   : > { %2390 = vmatprep.subr.mxu0 %v1869_v46 }
 0x573   : > { %2391 = vmatpush3.msra.mxu0 %v1869_v46 }
 0x574   : > { %2392 = vmatprep.subr.mxu0 %v1868_v47 }
 0x575   : > { %2393 = vmatpush3.msra.mxu0 %v1868_v47 }
 0x576   : > { %2394 = vmatprep.subr.mxu0 %v1867_v48 }
 0x577   : > { %2395 = vmatpush3.msra.mxu0 %v1867_v48 }
 0x578   : > { %2396 = vmatprep.subr.mxu0 %v1866_v49 }
 0x579   : > { %2397 = vmatpush3.msra.mxu0 %v1866_v49 }
 0x57a   : > { %2398 = vmatprep.subr.mxu0 %v1865_v50 }
 0x57b   : > { %2399 = vmatpush3.msra.mxu0 %v1865_v50 }
 0x57c   : > { %2400 = vmatprep.subr.mxu0 %v1864_v10 }
 0x57d   : > { %2401 = vmatpush3.msra.mxu0 %v1864_v10 }
 0x628   : > { %v2368_v52 = vpop.f32.mrf.mxu0 }
 0x629   : > { %v1726_v54 = vadd.f32 %v2368_v52, %v2174_v51 }
 0x62a   : > { %v1720_v55 = vpop.f32.mrf.mxu0 }
 0x62b   : > { %v1732_v57 = vsub.f32 %v1726_v54, %v1730_v53  ;;  %v1721_v58 = vadd.f32 %v2174_v51, %v1720_v55 }
 0x62d   : > { %v1734_v59 = vmul.f32 0.5, %v1732_v57  ;;  %v1731_v60 = vsub.f32 %v1721_v58, %v1729_v56 }
 0x62f   : > { %v1736_v61 = vadd.f32 %v1734_v59, %v1730_v53  ;;  %v1733_v62 = vmul.f32 0.5, %v1731_v60 }
 0x631   : > { %vm1738_vm13 = vcmp.ge.f32.partialorder %v1736_v61, 0.5  ;;  %v1735_v63 = vadd.f32 %v1733_v62, %v1729_v56 }
 0x632   : > { %v1740_v0 = vsel %vm1738_vm13, 1.0, %v2771_v32 }
 0x633   : > { %v1742_v1 = vsub.f32 1.0, %v1740_v0  ;;  %vm1737_vm14 = vcmp.ge.f32.partialorder %v1735_v63, 0.5  ;;  %v3167_v8 = vadd.f32 %v1740_v0, %v3031_v6  ;;  %v1862_v6 = vld [vmem:[%s3288_s11 + $0x18] sm:$0xff] }
 0x634   : > { %v1739_v2 = vsel %vm1737_vm14, 1.0, %v2771_v32 }
 0x635   : > { %v1744_v4 = vmul.f32 %v1742_v1, %v1736_v61  ;;  %v1741_v5 = vsub.f32 1.0, %v1739_v2  ;;  %v3164_v7 = vadd.f32 %v1739_v2, %v3020_v3  ;;  %v1863_v3 = vld [vmem:[%s3288_s11 + $0x20] sm:$0xff] }
 0x636   : > { %2402 = vmatprep.subr.mxu0 %v1863_v3 }
 0x637   : > { %1746 = vst.msk [vmem:[#allocation6 + $0x8] sm:$0xff] %vm558_vm1, %v1744_v4  ;;  %v1743_v9 = vmul.f32 %v1741_v5, %v1735_v63  ;;  %2377 = vmatprep.mubr.msk.f32.mxu1 %vm558_vm1, %v3164_v7  ;;  %2403 = vmatpush3.msra.mxu0 %v1863_v3 }
 0x638   : > { %2378 = vmatmul.mubr.msk.f32.vlgmr.msra.gmra.mxu1 %vm558_vm1, %v3167_v8  ;;  %2404 = vmatprep.subr.mxu0 %v1862_v6 }
 0x639   : > { %1745 = vst.msk [vmem:[#allocation6] sm:$0xff] %vm558_vm1, %v1743_v9  ;;  %2405 = vmatpush3.msra.mxu0 %v1862_v6 }
 0x63a   : > { %2406 = vmatprep.subr.mxu0 %v1861_v11 }
 0x63b   : > { %2407 = vmatpush3.msra.mxu0 %v1861_v11 }
 0x63c   : > { %2408 = vmatprep.subr.mxu0 %v1860_v13 }
 0x63d   : > { %2409 = vmatpush3.msra.mxu0 %v1860_v13 }
 0x63e   : > { %2410 = vmatprep.subr.mxu0 %v1859_v14 }
 0x63f   : > { %2411 = vmatpush3.msra.mxu0 %v1859_v14 }
 0x6f8   : > { %v2379_v16 = vpop.f32.mrf.mxu1 }
 0x6f9   : > { %v1838_v18 = vadd.f32 %v2379_v16, %v2177_v15 }
 0x6fa   : > { %v1832_v19 = vpop.f32.mrf.mxu1 }
 0x6fb   : > { %v1844_v21 = vsub.f32 %v1838_v18, %v1842_v17  ;;  %v1833_v22 = vadd.f32 %v2177_v15, %v1832_v19 }
 0x6fd   : > { %v1846_v23 = vmul.f32 0.5, %v1844_v21  ;;  %v1843_v24 = vsub.f32 %v1833_v22, %v1841_v20 }
 0x6ff   : > { %v1848_v25 = vadd.f32 %v1846_v23, %v1842_v17  ;;  %v1845_v26 = vmul.f32 0.5, %v1843_v24 }
 0x701   : > { %v1847_v27 = vadd.f32 %v1845_v26, %v1841_v20  ;;  %vm1850_vm15 = vcmp.ge.f32.partialorder %v1848_v25, 0.5 }
 0x702   : > { %v1852_v28 = vsel %vm1850_vm15, 1.0, %v2771_v32 }
 0x703   : > { %vm1849_vm0 = vcmp.ge.f32.partialorder %v1847_v27, 0.5  ;;  %v1854_v29 = vsub.f32 1.0, %v1852_v28 }
 0x704   : > { %v1851_v30 = vsel %vm1849_vm0, 1.0, %v2771_v32  ;;  %2412 = vmatprep.mubr.msk.f32.mxu0 %vm1849_vm0, %v2774_v12 }
 0x705   : > { %v1853_v31 = vsub.f32 1.0, %v1851_v30  ;;  %v1856_v33 = vmul.f32 %v1854_v29, %v1848_v25  ;;  %2413 = vmatmul.mubr.msk.f32.vlgmr.msra.gmra.mxu0 %vm1850_vm15, %v2774_v12 }
 0x707   : > { %v1855_v34 = vmul.f32 %v1853_v31, %v1847_v27  ;;  %1858 = vst [vmem:[#allocation7 + $0x8] sm:$0xff] %v1856_v33 }
 0x709   : > { %1857 = vst [vmem:[#allocation7] sm:$0xff] %v1855_v34 }
 0x7c5   : > { %v2414_v36 = vpop.f32.mrf.mxu0 }
 0x7c6   : > { %v1954_v38 = vadd.f32 %v2414_v36, %v2180_v35 }
 0x7c7   : > { %v1948_v39 = vpop.f32.mrf.mxu0 }
 0x7c8   : > { %v1960_v41 = vsub.f32 %v1954_v38, %v1958_v37  ;;  %v1949_v42 = vadd.f32 %v2180_v35, %v1948_v39 }
 0x7ca   : > { %v1962_v43 = vmul.f32 0.5, %v1960_v41  ;;  %v1959_v12 = vsub.f32 %v1949_v42, %v1957_v40 }
 0x7cc   : > { %v1964_v44 = vadd.f32 %v1962_v43, %v1958_v37  ;;  %v1961_v45 = vmul.f32 0.5, %v1959_v12 }
 0x7ce   : > { %vm1966_vm2 = vcmp.ge.f32.partialorder %v1964_v44, 0.5  ;;  %v1963_v46 = vadd.f32 %v1961_v45, %v1957_v40 }
 0x7cf   : > { %v1968_v47 = vsel %vm1966_vm2, 1.0, %v2771_v32 }
 0x7d0   : > { %v1970_v48 = vsub.f32 1.0, %v1968_v47  ;;  %v1976_v49 = vadd.f32 %v1968_v47, %v3167_v8  ;;  %vm1965_vm3 = vcmp.ge.f32.partialorder %v1963_v46, 0.5 }
 0x7d1   : > { %v1967_v50 = vsel %vm1965_vm3, 1.0, %v2771_v32 }
 0x7d2   : > { %v1972_v51 = vmul.f32 %v1970_v48, %v1964_v44  ;;  %1978 = vst.msk [vmem:[%s3010_s25 + $0x8] sm:$0xff] %vm558_vm1, %v1976_v49  ;;  %v1969_v52 = vsub.f32 1.0, %v1967_v50  ;;  %v1975_v53 = vadd.f32 %v1967_v50, %v3164_v7 }
 0x7d4   : > { %1974 = vst.msk [vmem:[#allocation8 + $0x8] sm:$0xff] %vm558_vm1, %v1972_v51  ;;  %v1971_v54 = vmul.f32 %v1969_v52, %v1963_v46  ;;  %1977 = vst.msk [vmem:[%s3010_s25] sm:$0xff] %vm558_vm1, %v1975_v53 }
 0x7d5   : > { %2671 = shalt.err (!%p2668_p11)
}
 0x7d6   : > { %s2672_s18 = scalar_lea.hbm %s3212_s16, 256  ;;  %s2676_s14 = scalar_lea.hbm %s3313_s23, 2048 }
 0x7d7   : > { %p2673_p13 = scmp.ne.s32.totalorder %s3212_s16, %s2672_s18  ;;  %p2677_p10 = scmp.lt.s32.totalorder %s3212_s16, %s3313_s23 }
 0x7d8   : > { %p2678_p0 = scmp.lt.s32.totalorder %s2676_s14, %s2672_s18 }
 0x7d9   : > { %p2674_p2 = pnand %p2673_p13, %p2903_p3 }
 0x7da   : > { %p2679_p12 = por %p2678_p0, %p2677_p10 }
 0x7db   : > { %p2675_p5 = pneg %p2674_p2 }
 0x7dd   : > { %p2680_p1 = pnand %p2679_p12, %p2675_p5 }
 0x7df   : > { %2683 = shalt.err (!%p2680_p1)
}
 0x7e0   : > { %s2780_s19 = smov 128   ;;  %1973 = vst.msk [vmem:[#allocation8] sm:$0xff] %vm558_vm1, %v1971_v54 }
 0x7e1   : > { %2431 = dma.vmem_to_hbm [thread:$0]  (%p2903_p3), %s3217_s27, 256, %s3212_s16, %s3224_s20, %s2780_s19, %s2780_s19, %s2776_s21  }
 0x7e2 PF: > { %s3314_s24 = sld [smem:[#allocation22_spill]]  ;;  %p2458_p4 = scmp.ge.s32.totalorder %s2762_s15, 2 }
 0x7e3   : > { %s3315_s17 = sld [smem:[#allocation28_spill]] }
 0x7e8   : > { %s2010_s13 = sand.u32 1, %s3314_s24  }
 0x7e9   : > { %p3316_p6 = scmp.ne.s32.totalorder %s3315_s17, 0  ;;  %s2011_s18 = scalar_lea.sflag [#allocation11], %s2010_s13 }
 0x7eb   : > { %p2447_p7 = pnand %p2458_p4, %p3316_p6 }
 0x7ed   : > { %p2448_p8 = pneg %p2447_p7 }
 0x7ef   : > { %2729 = dma.done.wait (%p2448_p8), %s2011_s18, 256  }
 0x7f0   : > { %2731 = vsyncadd (%p2448_p8), %s2011_s18, 4294967040  ;;  %s29_s15 = sadd.s32 1, %s2762_s15   ;;  %s3317_s22 = sld [smem:[#allocation23_spill]] }
 0x7f1   : > { %p26_p9 = scmp.ge.s32.totalorder %s29_s15, 10   ;;  %s3318_s27 = sld [smem:[#allocation29_spill]] }
 0x7f2   : > { %s3319_s28 = sld [smem:[#allocation24_spill]]  ;;  %s3323_s25 = smov %s2738_s26 }
 0x7f3   : > { %s3320_s29 = sld [smem:[#allocation25_spill]]  ;;  %28 = sbr.rel (!%p26_p9) target bundleno = 10 (0xa), region = 128 }
 0x7f4   : > { %s3321_s30 = sld [smem:[#allocation26_spill]] }
 0x7f5   : > { %s3322_s14 = sld [smem:[#allocation27_spill]] }
 0x7f6   : > { %s3324_s26 = smov %s3317_s22 }
 0x7f8   :  { %2016 = vsyncpa [#allocation10], 1 }
 0x7f9   :  { %2018 = vsyncpa [#allocation10 + $0x1], 1 }
 0x7fa   :  { %2019 = vsyncpa [#allocation13], 1 }
 0x7fb   :  { %2020 = vsyncpa [#allocation16], 1 }
 0x7fc   :  { %2021 = vsyncpa [#allocation11], 1 }
 0x7fd   :  { %2023 = vsyncpa [#allocation11 + $0x1], 1 }

</bundles_post_ra>
